<compile_context>
chip_gen: v7x
topology: tpu7x:2x2x1
jax: 0.10.0
libtpu: 0.0.40
codegen_flags: <defaults>
</compile_context>

<pallas_src>
import functools
import math

import numpy as np
import jax
import jax.numpy as jnp
from jax.experimental import pallas as pl
from jax.experimental.pallas import tpu as pltpu

LN_EPS_LINEAR = 1e-5      # nn.LayerNorm default (LinearLayer)
LN_EPS_POS = 1e-12        # BERT-style LayerNorm (positional encoding / encoder)
NORM_EPS = 1e-12          # F.normalize eps
_MXU_DTYPE = jnp.bfloat16


def _derive_vmem_limit():
    """Scoped-VMEM budget: half of physical VMEM, capped at 48 MiB (so it is
    ~32 MiB on v7x's 64 MiB parts), conservative 32 MiB fallback."""
    try:
        cap = int(getattr(pltpu.get_tpu_info(), "vmem_capacity_bytes",
                          64 * 1024 * 1024))
        return max(min(cap // 2, 48 * 1024 * 1024), 16 * 1024 * 1024)
    except Exception:
        return 32 * 1024 * 1024


_VMEM_LIMIT = _derive_vmem_limit()


# ----------------------------- helpers -----------------------------
def _layernorm(x, gamma, beta, eps):
    mu = jnp.mean(x, axis=-1, keepdims=True)
    var = jnp.mean((x - mu) ** 2, axis=-1, keepdims=True)
    return (x - mu) * jax.lax.rsqrt(var + eps) * gamma + beta


def _l2norm(x):
    n = jnp.sqrt(jnp.sum(x * x, axis=-1, keepdims=True))
    return x / jnp.maximum(n, NORM_EPS)


def _pad_leading(x, n_pad):
    n = x.shape[0]
    if n == n_pad:
        return x
    widths = [(0, n_pad - n)] + [(0, 0)] * (x.ndim - 1)
    return jnp.pad(x, widths)


def _leading_block(n, cap):
    """Block for an unconstrained leading (video) grid axis.

    Keeps grid length >= 2 when n >= 2 (so v7x's two TensorCores both work)
    and block <= cap.  The caller pads n up to a multiple of the block —
    padding is preferred over shrinking so MXU / DMA tiles stay large."""
    if n <= 1:
        return 1, max(n, 1)
    bv = max(1, min(cap, (n + 1) // 2))
    n_pad = -(-n // bv) * bv
    return bv, n_pad


def _row_block(m, target):
    """Row block for 2D (rows, features) tiling: multiple of 8 (or the full,
    possibly tiny, m); caller pads rows up to a multiple of the block."""
    if m <= 8:
        return m, m
    half = ((m + 1) // 2 + 7) // 8 * 8
    bm = max(8, min((max(target, 8) // 8) * 8, half))
    m_pad = -(-m // bm) * bm
    return bm, m_pad


# ----------------------------- kernel A: fused encode_context -----------------------------
# clip_input_proj (LN->Linear->ReLU) -> clip_pos_embed (+pos, LN) -> GMM encoder block,
# all on the (bv, L, *) tile that never leaves VMEM.
def _encode_context_kernel(x_ref, g1_ref, b1_ref, w_ref, wb_ref, pos_ref,
                           g2_ref, b2_ref, wqkv_ref, wo_ref, mask_ref,
                           g3_ref, b3_ref, enc_ref, prop_ref, vid_ref, *, scale):
    bv, L, Dv = x_ref.shape
    H = w_ref.shape[1]
    S = mask_ref.shape[0]

    # ---- clip_input_proj: LayerNorm -> Linear -> ReLU ----
    x2 = x_ref[...].reshape(bv * L, Dv)
    xn = _layernorm(x2, g1_ref[...], b1_ref[...], LN_EPS_LINEAR)
    h = jnp.dot(xn.astype(_MXU_DTYPE), w_ref[...],
                preferred_element_type=jnp.float32) + wb_ref[...]
    h = jnp.maximum(h, 0.0)

    # ---- clip_pos_embed: + positional table, BERT LayerNorm ----
    h = h.reshape(bv, L, H) + pos_ref[...][None, :, :]
    feat = _layernorm(h, g2_ref[...], b2_ref[...], LN_EPS_POS)        # (bv, L, H)

    # ---- GMM block: fused-QKV attention with Gaussian-mixture masks ----
    f2 = feat.reshape(bv * L, H).astype(_MXU_DTYPE)
    qkv = jnp.dot(f2, wqkv_ref[...], preferred_element_type=jnp.float32)  # (bv*L, 3H)
    # fold 1/sqrt(H) into q (smaller tensor than the (bv,L,L) logits)
    q = (qkv[:, :H] * scale).reshape(bv, L, H).astype(_MXU_DTYPE)
    k = qkv[:, H:2 * H].reshape(bv, L, H).astype(_MXU_DTYPE)
    v = qkv[:, 2 * H:].reshape(bv, L, H).astype(_MXU_DTYPE)

    logits = jnp.einsum("bld,bmd->blm", q, k,
                        preferred_element_type=jnp.float32)           # (bv, L, L)
    # single exp pass; per-mixture softmax = (e * mask_s) / rowsum(e * mask_s)
    e = jnp.exp(logits - jnp.max(logits, axis=-1, keepdims=True))

    p_sum = jnp.zeros_like(e)
    pbar_parts = []
    for s in range(S):                                   # static, tiny S
        w_s = e * mask_ref[s][None, :, :]
        inv_d = pl.reciprocal(jnp.sum(w_s, axis=-1, keepdims=True), approx=True)
        p_s = w_s * inv_d
        p_sum = p_sum + p_s
        pbar_parts.append(jnp.mean(p_s, axis=1, keepdims=True))       # (bv, 1, L)
    pbar = jnp.concatenate(pbar_parts, axis=1)                        # (bv, S, L)

    # proposals: (mean_L p_s) @ v  — linearity of the PV matmul.
    prop_ref[...] = jnp.einsum("bsl,blh->bsh", pbar.astype(_MXU_DTYPE), v,
                               preferred_element_type=jnp.float32)    # (bv, S, H)
    # attention output: ONE PV matmul on the mixture-averaged probabilities.
    o = jnp.einsum("blm,bmh->blh", (p_sum * (1.0 / S)).astype(_MXU_DTYPE), v,
                   preferred_element_type=jnp.float32)                # (bv, L, H)

    y = feat + jnp.dot(o.reshape(bv * L, H).astype(_MXU_DTYPE), wo_ref[...],
                       preferred_element_type=jnp.float32).reshape(bv, L, H)
    enc = _layernorm(y, g3_ref[...], b3_ref[...], LN_EPS_POS)
    enc_ref[...] = enc                                                # encoded feat
    vid_ref[...] = jnp.mean(enc, axis=1, keepdims=True)               # pooled video (bv,1,H)


def encode_context(clip_feat, prep, pos, gmm_masks, *, target_rows=256):
    Nv, L, Dv = clip_feat.shape
    H = prep["vproj_w"].shape[1]
    S = gmm_masks.shape[0]
    # bv bounded by target_rows//L so the live (bv, L, L) logits/probs stay small.
    bv, nv_pad = _leading_block(Nv, max(1, target_rows // L))
    x = _pad_leading(clip_feat, nv_pad)
    kernel = functools.partial(_encode_context_kernel, scale=1.0 / math.sqrt(H))
    feat, prop, vid = pl.pallas_call(
        kernel,
        out_shape=(jax.ShapeDtypeStruct((nv_pad, L, H), jnp.float32),
                   jax.ShapeDtypeStruct((nv_pad, S, H), jnp.float32),
                   jax.ShapeDtypeStruct((nv_pad, 1, H), jnp.float32)),
        grid=(nv_pad // bv,),
        in_specs=[
            pl.BlockSpec((bv, L, Dv), lambda i: (i, 0, 0)),
            pl.BlockSpec((1, Dv), lambda i: (0, 0)),
            pl.BlockSpec((1, Dv), lambda i: (0, 0)),
            pl.BlockSpec((Dv, H), lambda i: (0, 0)),
            pl.BlockSpec((1, H), lambda i: (0, 0)),
            pl.BlockSpec((L, H), lambda i: (0, 0)),
            pl.BlockSpec((1, H), lambda i: (0, 0)),
            pl.BlockSpec((1, H), lambda i: (0, 0)),
            pl.BlockSpec((H, 3 * H), lambda i: (0, 0)),
            pl.BlockSpec((H, H), lambda i: (0, 0)),
            pl.BlockSpec((S, L, L), lambda i: (0, 0, 0)),
            pl.BlockSpec((1, H), lambda i: (0, 0)),
            pl.BlockSpec((1, H), lambda i: (0, 0)),
        ],
        out_specs=(pl.BlockSpec((bv, L, H), lambda i: (i, 0, 0)),
                   pl.BlockSpec((bv, S, H), lambda i: (i, 0, 0)),
                   pl.BlockSpec((bv, 1, H), lambda i: (i, 0, 0))),
        compiler_params=pltpu.CompilerParams(
            dimension_semantics=("parallel",), vmem_limit_bytes=_VMEM_LIMIT),
    )(x,
      prep["vproj_ln_g"], prep["vproj_ln_b"], prep["vproj_w"], prep["vproj_b"],
      pos, prep["pos_ln_g"], prep["pos_ln_b"],
      prep["wqkv"], prep["wo"], gmm_masks,
      prep["gmm_ln_g"], prep["gmm_ln_b"])
    return feat, prop, vid, bv


# ----------------------------- kernel B: LinearLayer (query path) -----------------------------
def _ln_linear_relu_kernel(x_ref, g_ref, b_ref, w_ref, bias_ref, o_ref):
    xn = _layernorm(x_ref[...], g_ref[...], b_ref[...], LN_EPS_LINEAR)
    y = jnp.dot(xn.astype(_MXU_DTYPE), w_ref[...],
                preferred_element_type=jnp.float32) + bias_ref[...]
    o_ref[...] = jnp.maximum(y, 0.0)


def ln_linear_relu(x, prep, *, target_rows=512):
    M, Din = x.shape
    H = prep["qproj_w"].shape[1]
    bm, m_pad = _row_block(M, target_rows)
    xp = _pad_leading(x, m_pad)
    out = pl.pallas_call(
        _ln_linear_relu_kernel,
        out_shape=jax.ShapeDtypeStruct((m_pad, H), jnp.float32),
        grid=(m_pad // bm,),
        in_specs=[
            pl.BlockSpec((bm, Din), lambda i: (i, 0)),
            pl.BlockSpec((1, Din), lambda i: (0, 0)),
            pl.BlockSpec((1, Din), lambda i: (0, 0)),
            pl.BlockSpec((Din, H), lambda i: (0, 0)),
            pl.BlockSpec((1, H), lambda i: (0, 0)),
        ],
        out_specs=pl.BlockSpec((bm, H), lambda i: (i, 0)),
        compiler_params=pltpu.CompilerParams(
            dimension_semantics=("parallel",), vmem_limit_bytes=_VMEM_LIMIT),
    )(xp, prep["qproj_ln_g"], prep["qproj_ln_b"], prep["qproj_w"], prep["qproj_b"])
    return out[:M]


# ----------------------------- kernel C: clip-scale scores -----------------------------
# Only emits what the forward consumes: unnormalized full scores (query-major, lane-dense
# along L), plus normalized / unnormalized per-(video, query) maxima. The previously
# produced full normalized tensor is never used and is no longer written to HBM.
def _scores_kernel(ctx_ref, q_ref, qinv_ref, su_ref, mn_ref, mu_ref):
    ctx = ctx_ref[...]                                       # (bv, L, H) f32
    q = q_ref[...]                                           # (Nq, H)    f32
    bv, L, H = ctx.shape
    Nq = q.shape[0]

    qb = jnp.broadcast_to(q.astype(_MXU_DTYPE)[None], (bv, Nq, H))
    su = jnp.einsum("bqh,blh->bql", qb, ctx.astype(_MXU_DTYPE),
                    preferred_element_type=jnp.float32)      # (bv, Nq, L)
    su_ref[...] = su
    mu = jnp.max(su, axis=-1)                                # (bv, Nq)
    mu_ref[...] = mu[:, None, :]

    # Normalized maxima with exact norms (matches F.normalize; no approx reciprocal).
    inv_c = 1.0 / jnp.maximum(jnp.sqrt(jnp.sum(ctx * ctx, axis=-1)), NORM_EPS)  # (bv, L)
    mn = jnp.max(su * inv_c[:, None, :], axis=-1) * qinv_ref[...]               # (bv, Nq)
    mn_ref[...] = mn[:, None, :]


def clip_scores_call(ctx_pad, query, nv_block):
    nv_pad, L, H = ctx_pad.shape
    Nq = query.shape[0]
    bv = nv_block
    q_norm = jnp.sqrt(jnp.sum(query * query, axis=-1, keepdims=True))   # (Nq, 1)
    q_inv = jnp.transpose(1.0 / jnp.maximum(q_norm, NORM_EPS))           # (1, Nq)
    return pl.pallas_call(
        _scores_kernel,
        out_shape=(jax.ShapeDtypeStruct((nv_pad, Nq, L), jnp.float32),
                   jax.ShapeDtypeStruct((nv_pad, 1, Nq), jnp.float32),
                   jax.ShapeDtypeStruct((nv_pad, 1, Nq), jnp.float32)),
        grid=(nv_pad // bv,),
        in_specs=[pl.BlockSpec((bv, L, H), lambda i: (i, 0, 0)),
                  pl.BlockSpec((Nq, H), lambda i: (0, 0)),
                  pl.BlockSpec((1, Nq), lambda i: (0, 0))],
        out_specs=(pl.BlockSpec((bv, Nq, L), lambda i: (i, 0, 0)),
                   pl.BlockSpec((bv, 1, Nq), lambda i: (i, 0, 0)),
                   pl.BlockSpec((bv, 1, Nq), lambda i: (i, 0, 0))),
        compiler_params=pltpu.CompilerParams(
            dimension_semantics=("parallel",), vmem_limit_bytes=_VMEM_LIMIT),
    )(ctx_pad, query, q_inv)


# ----------------------------- kernel D: rank loss -----------------------------
def _rank_loss_kernel(prop_ref, vid_ref, q_ref, lab_ref, loss_ref, *, margin):
    prop = prop_ref[...]                                     # (Nv, S, H)
    vid = vid_ref[...]                                       # (Nv, H)
    q = q_ref[...]                                           # (Nq, H)
    labels = lab_ref[...]                                    # (1, Nq) int32
    Nv, S, H = prop.shape
    Nq = q.shape[0]

    qn = _l2norm(q)
    pn = _l2norm(prop)
    vn = _l2norm(vid)
    qt = qn.T.astype(_MXU_DTYPE)                             # (H, Nq)

    # One batched matmul over all (video, proposal) pairs, then max over proposals.
    moment = jnp.dot(pn.reshape(Nv * S, H).astype(_MXU_DTYPE), qt,
                     preferred_element_type=jnp.float32).reshape(Nv, S, Nq)
    pos = jnp.max(moment, axis=1)                            # (Nv, Nq)
    ref = jnp.dot(vn.astype(_MXU_DTYPE), qt,
                  preferred_element_type=jnp.float32)        # (Nv, Nq)

    onehot = (jax.lax.broadcasted_iota(jnp.int32, (Nv, Nq), 0) == labels
              ).astype(jnp.float32)                          # padded video rows never match
    pms = jnp.sum(pos * onehot, axis=0, keepdims=True)       # (1, Nq) = pos[label_q, q]
    qcs = jnp.sum(ref * onehot, axis=0, keepdims=True)       # (1, Nq)

    loss = jnp.sum(jnp.maximum(margin + qcs - pms, 0.0)) * (1.0 / Nq)
    loss_ref[...] = jnp.reshape(loss, (1, 1))


def rank_loss_call(prop, video, query, labels, margin=0.02):
    Nv, S, H = prop.shape
    Nq = query.shape[0]
    labels2 = labels.astype(jnp.int32).reshape(1, Nq)
    out = pl.pallas_call(
        functools.partial(_rank_loss_kernel, margin=margin),
        out_shape=jax.ShapeDtypeStruct((1, 1), jnp.float32),
        grid=(1,),
        in_specs=[pl.BlockSpec((Nv, S, H), lambda i: (0, 0, 0)),
                  pl.BlockSpec((Nv, H), lambda i: (0, 0)),
                  pl.BlockSpec((Nq, H), lambda i: (0, 0)),
                  pl.BlockSpec((1, Nq), lambda i: (0, 0))],
        out_specs=pl.BlockSpec((1, 1), lambda i: (0, 0)),
        compiler_params=pltpu.CompilerParams(dimension_semantics=("arbitrary",)),
    )(prop, video, query, labels2)
    return out[0, 0]


# ----------------------------- parameters / masks -----------------------------
def init_params(key, cfg):
    ks = jax.random.split(key, 8)
    std = cfg["initializer_range"]
    H = cfg["hidden_size"]
    return {
        "pos_embed": std * jax.random.normal(ks[0], (cfg["max_ctx_l"], H), jnp.float32),
        "pos_ln_g": jnp.ones((H,), jnp.float32),
        "pos_ln_b": jnp.zeros((H,), jnp.float32),
        "qproj_ln_g": jnp.ones((cfg["query_input_size"],), jnp.float32),
        "qproj_ln_b": jnp.zeros((cfg["query_input_size"],), jnp.float32),
        "qproj_w": std * jax.random.normal(ks[1], (cfg["query_input_size"], H), jnp.float32),
        "qproj_b": jnp.zeros((H,), jnp.float32),
        "vproj_ln_g": jnp.ones((cfg["visual_input_size"],), jnp.float32),
        "vproj_ln_b": jnp.zeros((cfg["visual_input_size"],), jnp.float32),
        "vproj_w": std * jax.random.normal(ks[2], (cfg["visual_input_size"], H), jnp.float32),
        "vproj_b": jnp.zeros((H,), jnp.float32),
        "wq": std * jax.random.normal(ks[3], (H, H), jnp.float32),
        "wk": std * jax.random.normal(ks[4], (H, H), jnp.float32),
        "wv": std * jax.random.normal(ks[5], (H, H), jnp.float32),
        "wo": std * jax.random.normal(ks[6], (H, H), jnp.float32),
        "gmm_ln_g": jnp.ones((H,), jnp.float32),
        "gmm_ln_b": jnp.zeros((H,), jnp.float32),
    }


def make_gmm_log_masks(L, sigmas):
    """Gaussian exponent -d^2 / (2*sigma^2); the masks themselves are exp() of this."""
    idx = jnp.arange(L, dtype=jnp.float32)
    d2 = (idx[:, None] - idx[None, :]) ** 2
    return jnp.stack([-d2 / (2.0 * s * s) for s in sigmas], axis=0)   # (S, L, L)


def prepare_params(params, cfg):
    """One-time parameter preprocessing hoisted out of the hot forward path:
    bf16 weight casts, fused QKV concat, (1, D)-reshaped LN params, exp() mask table."""
    return {
        "vproj_ln_g": params["vproj_ln_g"].reshape(1, -1),
        "vproj_ln_b": params["vproj_ln_b"].reshape(1, -1),
        "vproj_w": params["vproj_w"].astype(_MXU_DTYPE),
        "vproj_b": params["vproj_b"].reshape(1, -1),
        "pos_embed": params["pos_embed"],
        "pos_ln_g": params["pos_ln_g"].reshape(1, -1),
        "pos_ln_b": params["pos_ln_b"].reshape(1, -1),
        "qproj_ln_g": params["qproj_ln_g"].reshape(1, -1),
        "qproj_ln_b": params["qproj_ln_b"].reshape(1, -1),
        "qproj_w": params["qproj_w"].astype(_MXU_DTYPE),
        "qproj_b": params["qproj_b"].reshape(1, -1),
        "wqkv": jnp.concatenate([params["wq"], params["wk"], params["wv"]],
                                axis=1).astype(_MXU_DTYPE),
        "wo": params["wo"].astype(_MXU_DTYPE),
        "gmm_ln_g": params["gmm_ln_g"].reshape(1, -1),
        "gmm_ln_b": params["gmm_ln_b"].reshape(1, -1),
        "gmm_masks": jnp.exp(make_gmm_log_masks(cfg["max_ctx_l"], cfg["gmm_sigmas"])),
    }


# ----------------------------- forward (mirrors GMMFormer_Net.forward) -----------------------------
def gmmformer_forward(prep, batch, cfg):
    clip_video_feat = batch["clip_video_features"]   # (Nv, L, Dv)
    query_feat = batch["text_feat"]                  # (Nq, Dq)
    labels_host = np.asarray(batch["text_labels"])   # host labels (no device sync)
    _ = batch.get("text_mask")                       # unused by this forward path
    _ = batch.get("frame_video_features")            # read but unused (as in reference)
    _ = batch.get("videos_mask")

    Nv, L, _Dv = clip_video_feat.shape

    gmm_masks = prep["gmm_masks"]
    if gmm_masks.shape[1] != L:                      # fallback for non-default lengths
        gmm_masks = jnp.exp(make_gmm_log_masks(L, cfg["gmm_sigmas"]))
    pos = prep["pos_embed"][:L]

    # ---- encode_context: ONE fused pallas_call (input proj + pos embed + GMM encoder) ----
    feat_pad, prop_pad, vid_pad, bv = encode_context(clip_video_feat, prep, pos, gmm_masks)
    video_pad = vid_pad[:, 0, :]                     # (Nv_pad, H); padded rows are ignored below

    # ---- encode_query ----
    video_query = ln_linear_relu(query_feat, prep)   # (Nq, H)

    # ---- get_pred_from_raw_query (clip-scale scores; only consumed tensors emitted) ----
    s_u, m_n, m_u = clip_scores_call(feat_pad, video_query, bv)
    clip_scale_scores = m_n[:Nv, 0, :].T             # (Nq, Nv) normalized max
    clip_scale_scores_ = m_u[:Nv, 0, :].T            # (Nq, Nv) unnormalized max
    clip_scores = jnp.transpose(s_u[:Nv], (1, 2, 0))  # (Nq, L, Nv) unnormalized full

    # ---- rank loss over proposals / pooled video (labels index only real videos) ----
    labels_dev = jnp.asarray(labels_host, dtype=jnp.int32)
    rank_loss = rank_loss_call(prop_pad, video_pad, video_query, labels_dev)

    label_dict = {}
    for index, label in enumerate(labels_host.tolist()):
        label_dict.setdefault(int(label), []).append(index)

    return [rank_loss, clip_scale_scores, clip_scale_scores_, label_dict,
            video_query, gmm_masks, clip_scores]


# ----------------------------- main -----------------------------
if __name__ == "__main__":
    # H is a multiple of 128 so the fused-QKV slices and every kernel output are
    # lane-aligned (matches the real GMMFormer where H=384).
    cfg = dict(
        max_ctx_l=16, hidden_size=128,
        query_input_size=128, visual_input_size=256,
        initializer_range=0.02, gmm_sigmas=(1.0, 2.0, 4.0),
        input_drop=0.0, drop=0.0, n_heads=4,
        event_size=3, map_size=16, batch_size=2,
    )
    key = jax.random.PRNGKey(0)
    pkey, dkey = jax.random.split(key)
    params = init_params(pkey, cfg)
    prep = prepare_params(params, cfg)               # one-time weight preprocessing

    k1, k2 = jax.random.split(dkey)
    Nv, L, Nq = 2, cfg["max_ctx_l"], 4
    batch = {
        "clip_video_features": jax.random.normal(
            k1, (Nv, L, cfg["visual_input_size"]), jnp.float32),
        "text_feat": jax.random.normal(k2, (Nq, cfg["query_input_size"]), jnp.float32),
        "text_mask": jnp.ones((Nq, 8), jnp.float32),
        "text_labels": np.array([0, 1, 0, 1], np.int32),   # host-side labels
        "frame_video_features": None,
        "videos_mask": None,
    }

    outs = gmmformer_forward(prep, batch, cfg)
    rank_loss, css, css_, label_dict, vq, gmasks, cscores = outs
    jax.block_until_ready((rank_loss, css, css_, vq, gmasks, cscores))

    assert css.shape == (Nq, Nv) and css_.shape == (Nq, Nv)
    assert cscores.shape == (Nq, L, Nv) and vq.shape == (Nq, cfg["hidden_size"])
    assert bool(jnp.isfinite(rank_loss))
    print("KERNEL_OK")
</pallas_src>

<mosaic_0001>
module attributes {stable_mosaic.version = 11 : i64} {
  func.func @_encode_context_kernel(%arg0: i32, %arg1: memref<1x16x256xf32, #tpu.memory_space<vmem>>, %arg2: memref<1x256xf32, #tpu.memory_space<vmem>>, %arg3: memref<1x256xf32, #tpu.memory_space<vmem>>, %arg4: memref<256x128xbf16, #tpu.memory_space<vmem>>, %arg5: memref<1x128xf32, #tpu.memory_space<vmem>>, %arg6: memref<16x128xf32, #tpu.memory_space<vmem>>, %arg7: memref<1x128xf32, #tpu.memory_space<vmem>>, %arg8: memref<1x128xf32, #tpu.memory_space<vmem>>, %arg9: memref<128x384xbf16, #tpu.memory_space<vmem>>, %arg10: memref<128x128xbf16, #tpu.memory_space<vmem>>, %arg11: memref<3x16x16xf32, #tpu.memory_space<vmem>>, %arg12: memref<1x128xf32, #tpu.memory_space<vmem>>, %arg13: memref<1x128xf32, #tpu.memory_space<vmem>>, %arg14: memref<1x16x128xf32, #tpu.memory_space<vmem>>, %arg15: memref<1x3x128xf32, #tpu.memory_space<vmem>>, %arg16: memref<1x1x128xf32, #tpu.memory_space<vmem>>) attributes {dimension_semantics = [#tpu.dimension_semantics<parallel>], iteration_bounds = array<i64: 2>, scalar_prefetch = 0 : i64, scratch_operands = 0 : i64, tpu.core_type = #tpu.core_type<tc>, window_params = [{transform_indices = @transform_0, window_bounds = array<i64: 1, 16, 256>}, {pipeline_mode = #tpu.pipeline_mode<synchronous>, transform_indices = @transform_1, window_bounds = array<i64: 1, 256>}, {pipeline_mode = #tpu.pipeline_mode<synchronous>, transform_indices = @transform_2, window_bounds = array<i64: 1, 256>}, {pipeline_mode = #tpu.pipeline_mode<synchronous>, transform_indices = @transform_3, window_bounds = array<i64: 256, 128>}, {pipeline_mode = #tpu.pipeline_mode<synchronous>, transform_indices = @transform_4, window_bounds = array<i64: 1, 128>}, {pipeline_mode = #tpu.pipeline_mode<synchronous>, transform_indices = @transform_5, window_bounds = array<i64: 16, 128>}, {pipeline_mode = #tpu.pipeline_mode<synchronous>, transform_indices = @transform_6, window_bounds = array<i64: 1, 128>}, {pipeline_mode = #tpu.pipeline_mode<synchronous>, transform_indices = @transform_7, window_bounds = array<i64: 1, 128>}, {pipeline_mode = #tpu.pipeline_mode<synchronous>, transform_indices = @transform_8, window_bounds = array<i64: 128, 384>}, {pipeline_mode = #tpu.pipeline_mode<synchronous>, transform_indices = @transform_9, window_bounds = array<i64: 128, 128>}, {pipeline_mode = #tpu.pipeline_mode<synchronous>, transform_indices = @transform_10, window_bounds = array<i64: 3, 16, 16>}, {pipeline_mode = #tpu.pipeline_mode<synchronous>, transform_indices = @transform_11, window_bounds = array<i64: 1, 128>}, {pipeline_mode = #tpu.pipeline_mode<synchronous>, transform_indices = @transform_12, window_bounds = array<i64: 1, 128>}, {transform_indices = @transform_13, window_bounds = array<i64: 1, 16, 128>}, {transform_indices = @transform_14, window_bounds = array<i64: 1, 3, 128>}, {transform_indices = @transform_15, window_bounds = array<i64: 1, 1, 128>}]} {
    %c0 = arith.constant 0 : index
    %c0_0 = arith.constant 0 : index
    %c0_1 = arith.constant 0 : index
    %0 = vector.load %arg1[%c0, %c0_0, %c0_1] : memref<1x16x256xf32, #tpu.memory_space<vmem>>, vector<1x16x256xf32>
    %1 = vector.shape_cast %0 : vector<1x16x256xf32> to vector<16x256xf32>
    %c0_2 = arith.constant 0 : index
    %c0_3 = arith.constant 0 : index
    %2 = vector.load %arg2[%c0_2, %c0_3] : memref<1x256xf32, #tpu.memory_space<vmem>>, vector<1x256xf32>
    %c0_4 = arith.constant 0 : index
    %c0_5 = arith.constant 0 : index
    %3 = vector.load %arg3[%c0_4, %c0_5] : memref<1x256xf32, #tpu.memory_space<vmem>>, vector<1x256xf32>
    %cst = arith.constant dense<0.000000e+00> : vector<16xf32>
    %4 = vector.multi_reduction <add>, %1, %cst [1] : vector<16x256xf32> to vector<16xf32>
    %5 = vector.shape_cast %4 : vector<16xf32> to vector<16x1xf32>
    %cst_6 = arith.constant 2.560000e+02 : f32
    %6 = vector.broadcast %cst_6 : f32 to vector<16x1xf32>
    %7 = arith.divf %5, %6 : vector<16x1xf32>
    %8 = vector.broadcast %7 : vector<16x1xf32> to vector<16x256xf32>
    %9 = arith.subf %1, %8 : vector<16x256xf32>
    %10 = arith.mulf %9, %9 : vector<16x256xf32>
    %cst_7 = arith.constant dense<0.000000e+00> : vector<16xf32>
    %11 = vector.multi_reduction <add>, %10, %cst_7 [1] : vector<16x256xf32> to vector<16xf32>
    %12 = vector.shape_cast %11 : vector<16xf32> to vector<16x1xf32>
    %cst_8 = arith.constant 2.560000e+02 : f32
    %13 = vector.broadcast %cst_8 : f32 to vector<16x1xf32>
    %14 = arith.divf %12, %13 : vector<16x1xf32>
    %15 = vector.broadcast %7 : vector<16x1xf32> to vector<16x256xf32>
    %16 = arith.subf %1, %15 : vector<16x256xf32>
    %cst_9 = arith.constant 9.99999974E-6 : f32
    %17 = vector.broadcast %cst_9 : f32 to vector<16x1xf32>
    %18 = arith.addf %14, %17 : vector<16x1xf32>
    %19 = math.rsqrt %18 : vector<16x1xf32>
    %20 = vector.broadcast %19 : vector<16x1xf32> to vector<16x256xf32>
    %21 = arith.mulf %16, %20 : vector<16x256xf32>
    %22 = vector.broadcast %2 : vector<1x256xf32> to vector<16x256xf32>
    %23 = arith.mulf %21, %22 : vector<16x256xf32>
    %24 = vector.broadcast %3 : vector<1x256xf32> to vector<16x256xf32>
    %25 = arith.addf %23, %24 : vector<16x256xf32>
    %26 = arith.truncf %25 : vector<16x256xf32> to vector<16x256xbf16>
    %c0_10 = arith.constant 0 : index
    %c0_11 = arith.constant 0 : index
    %27 = vector.load %arg4[%c0_10, %c0_11] : memref<256x128xbf16, #tpu.memory_space<vmem>>, vector<256x128xbf16>
    %cst_12 = arith.constant dense<0.000000e+00> : vector<16x128xf32>
    %28 = tpu.matmul %26, %27, %cst_12 {dimension_numbers = #tpu.dot_dimension_numbers<[1], [0], [0], [1], [0, 0, 1, 1], [], []>} : vector<16x256xbf16>, vector<256x128xbf16>, vector<16x128xf32> -> vector<16x128xf32>
    %c0_13 = arith.constant 0 : index
    %c0_14 = arith.constant 0 : index
    %29 = vector.load %arg5[%c0_13, %c0_14] : memref<1x128xf32, #tpu.memory_space<vmem>>, vector<1x128xf32>
    %30 = vector.broadcast %29 : vector<1x128xf32> to vector<16x128xf32>
    %31 = arith.addf %28, %30 : vector<16x128xf32>
    %cst_15 = arith.constant 0.000000e+00 : f32
    %32 = vector.broadcast %cst_15 : f32 to vector<16x128xf32>
    %33 = arith.maximumf %31, %32 : vector<16x128xf32>
    %34 = vector.shape_cast %33 : vector<16x128xf32> to vector<1x16x128xf32>
    %c0_16 = arith.constant 0 : index
    %c0_17 = arith.constant 0 : index
    %35 = vector.load %arg6[%c0_16, %c0_17] : memref<16x128xf32, #tpu.memory_space<vmem>>, vector<16x128xf32>
    %36 = vector.shape_cast %35 : vector<16x128xf32> to vector<1x16x128xf32>
    %37 = arith.addf %34, %36 : vector<1x16x128xf32>
    %c0_18 = arith.constant 0 : index
    %c0_19 = arith.constant 0 : index
    %38 = vector.load %arg7[%c0_18, %c0_19] : memref<1x128xf32, #tpu.memory_space<vmem>>, vector<1x128xf32>
    %c0_20 = arith.constant 0 : index
    %c0_21 = arith.constant 0 : index
    %39 = vector.load %arg8[%c0_20, %c0_21] : memref<1x128xf32, #tpu.memory_space<vmem>>, vector<1x128xf32>
    %cst_22 = arith.constant dense<0.000000e+00> : vector<1x16xf32>
    %40 = vector.multi_reduction <add>, %37, %cst_22 [2] : vector<1x16x128xf32> to vector<1x16xf32>
    %41 = vector.shape_cast %40 : vector<1x16xf32> to vector<1x16x1xf32>
    %cst_23 = arith.constant 1.280000e+02 : f32
    %42 = vector.broadcast %cst_23 : f32 to vector<1x16x1xf32>
    %43 = arith.divf %41, %42 : vector<1x16x1xf32>
    %44 = vector.broadcast %43 : vector<1x16x1xf32> to vector<1x16x128xf32>
    %45 = arith.subf %37, %44 : vector<1x16x128xf32>
    %46 = arith.mulf %45, %45 : vector<1x16x128xf32>
    %cst_24 = arith.constant dense<0.000000e+00> : vector<1x16xf32>
    %47 = vector.multi_reduction <add>, %46, %cst_24 [2] : vector<1x16x128xf32> to vector<1x16xf32>
    %48 = vector.shape_cast %47 : vector<1x16xf32> to vector<1x16x1xf32>
    %cst_25 = arith.constant 1.280000e+02 : f32
    %49 = vector.broadcast %cst_25 : f32 to vector<1x16x1xf32>
    %50 = arith.divf %48, %49 : vector<1x16x1xf32>
    %51 = vector.broadcast %43 : vector<1x16x1xf32> to vector<1x16x128xf32>
    %52 = arith.subf %37, %51 : vector<1x16x128xf32>
    %cst_26 = arith.constant 9.99999996E-13 : f32
    %53 = vector.broadcast %cst_26 : f32 to vector<1x16x1xf32>
    %54 = arith.addf %50, %53 : vector<1x16x1xf32>
    %55 = math.rsqrt %54 : vector<1x16x1xf32>
    %56 = vector.broadcast %55 : vector<1x16x1xf32> to vector<1x16x128xf32>
    %57 = arith.mulf %52, %56 : vector<1x16x128xf32>
    %58 = vector.shape_cast %38 : vector<1x128xf32> to vector<1x1x128xf32>
    %59 = vector.broadcast %58 : vector<1x1x128xf32> to vector<1x16x128xf32>
    %60 = arith.mulf %57, %59 : vector<1x16x128xf32>
    %61 = vector.shape_cast %39 : vector<1x128xf32> to vector<1x1x128xf32>
    %62 = vector.broadcast %61 : vector<1x1x128xf32> to vector<1x16x128xf32>
    %63 = arith.addf %60, %62 : vector<1x16x128xf32>
    %64 = vector.shape_cast %63 : vector<1x16x128xf32> to vector<16x128xf32>
    %65 = arith.truncf %64 : vector<16x128xf32> to vector<16x128xbf16>
    %c0_27 = arith.constant 0 : index
    %c0_28 = arith.constant 0 : index
    %66 = vector.load %arg9[%c0_27, %c0_28] : memref<128x384xbf16, #tpu.memory_space<vmem>>, vector<128x384xbf16>
    %cst_29 = arith.constant dense<0.000000e+00> : vector<16x384xf32>
    %67 = tpu.matmul %65, %66, %cst_29 {dimension_numbers = #tpu.dot_dimension_numbers<[1], [0], [0], [1], [0, 0, 1, 1], [], []>} : vector<16x128xbf16>, vector<128x384xbf16>, vector<16x384xf32> -> vector<16x384xf32>
    %68 = vector.extract_strided_slice %67 {offsets = [0, 0], sizes = [16, 128], strides = [1, 1]} : vector<16x384xf32> to vector<16x128xf32>
    %cst_30 = arith.constant 0.0883883461 : f32
    %69 = vector.broadcast %cst_30 : f32 to vector<16x128xf32>
    %70 = arith.mulf %68, %69 : vector<16x128xf32>
    %71 = vector.shape_cast %70 : vector<16x128xf32> to vector<1x16x128xf32>
    %72 = arith.truncf %71 : vector<1x16x128xf32> to vector<1x16x128xbf16>
    %73 = vector.extract_strided_slice %67 {offsets = [0, 128], sizes = [16, 128], strides = [1, 1]} : vector<16x384xf32> to vector<16x128xf32>
    %74 = vector.shape_cast %73 : vector<16x128xf32> to vector<1x16x128xf32>
    %75 = arith.truncf %74 : vector<1x16x128xf32> to vector<1x16x128xbf16>
    %76 = vector.extract_strided_slice %67 {offsets = [0, 256], sizes = [16, 128], strides = [1, 1]} : vector<16x384xf32> to vector<16x128xf32>
    %77 = vector.shape_cast %76 : vector<16x128xf32> to vector<1x16x128xf32>
    %78 = arith.truncf %77 : vector<1x16x128xf32> to vector<1x16x128xbf16>
    "tpu.trace_start"() <{level = 10 : i32, message = "bld,bmd->blm"}> : () -> ()
    %cst_31 = arith.constant dense<0.000000e+00> : vector<1x16x16xf32>
    %79 = tpu.matmul %72, %75, %cst_31 {dimension_numbers = #tpu.dot_dimension_numbers<[2], [2], [1], [1], [0, 0, 0, 1, 1, 1], [0], [0]>} : vector<1x16x128xbf16>, vector<1x16x128xbf16>, vector<1x16x16xf32> -> vector<1x16x16xf32>
    "tpu.trace_stop"() : () -> ()
    %cst_32 = arith.constant dense<0xFF800000> : vector<1x16xf32>
    %80 = vector.multi_reduction <maximumf>, %79, %cst_32 [2] : vector<1x16x16xf32> to vector<1x16xf32>
    %81 = vector.shape_cast %80 : vector<1x16xf32> to vector<1x16x1xf32>
    %82 = vector.broadcast %81 : vector<1x16x1xf32> to vector<1x16x16xf32>
    %83 = arith.subf %79, %82 : vector<1x16x16xf32>
    %84 = math.exp %83 : vector<1x16x16xf32>
    %cst_33 = arith.constant 0.000000e+00 : f32
    %85 = vector.broadcast %cst_33 : f32 to vector<1x16x16xf32>
    %c0_34 = arith.constant 0 : index
    %c0_35 = arith.constant 0 : index
    %c0_36 = arith.constant 0 : index
    %86 = vector.load %arg11[%c0_34, %c0_35, %c0_36] : memref<3x16x16xf32, #tpu.memory_space<vmem>>, vector<1x16x16xf32>
    %87 = vector.shape_cast %86 : vector<1x16x16xf32> to vector<16x16xf32>
    %88 = vector.shape_cast %87 : vector<16x16xf32> to vector<1x16x16xf32>
    %89 = arith.mulf %84, %88 : vector<1x16x16xf32>
    %cst_37 = arith.constant dense<0.000000e+00> : vector<1x16xf32>
    %90 = vector.multi_reduction <add>, %89, %cst_37 [2] : vector<1x16x16xf32> to vector<1x16xf32>
    %91 = vector.shape_cast %90 : vector<1x16xf32> to vector<1x16x1xf32>
    %92 = tpu.reciprocal %91 {approx = true} : vector<1x16x1xf32> -> vector<1x16x1xf32>
    %93 = vector.broadcast %92 : vector<1x16x1xf32> to vector<1x16x16xf32>
    %94 = arith.mulf %89, %93 : vector<1x16x16xf32>
    %95 = arith.addf %85, %94 : vector<1x16x16xf32>
    %cst_38 = arith.constant dense<0.000000e+00> : vector<1x16xf32>
    %96 = vector.multi_reduction <add>, %94, %cst_38 [1] : vector<1x16x16xf32> to vector<1x16xf32>
    %97 = vector.shape_cast %96 : vector<1x16xf32> to vector<1x1x16xf32>
    %cst_39 = arith.constant 1.600000e+01 : f32
    %98 = vector.broadcast %cst_39 : f32 to vector<1x1x16xf32>
    %99 = arith.divf %97, %98 : vector<1x1x16xf32>
    %c1 = arith.constant 1 : index
    %c0_40 = arith.constant 0 : index
    %c0_41 = arith.constant 0 : index
    %100 = vector.load %arg11[%c1, %c0_40, %c0_41] : memref<3x16x16xf32, #tpu.memory_space<vmem>>, vector<1x16x16xf32>
    %101 = vector.shape_cast %100 : vector<1x16x16xf32> to vector<16x16xf32>
    %102 = vector.shape_cast %101 : vector<16x16xf32> to vector<1x16x16xf32>
    %103 = arith.mulf %84, %102 : vector<1x16x16xf32>
    %cst_42 = arith.constant dense<0.000000e+00> : vector<1x16xf32>
    %104 = vector.multi_reduction <add>, %103, %cst_42 [2] : vector<1x16x16xf32> to vector<1x16xf32>
    %105 = vector.shape_cast %104 : vector<1x16xf32> to vector<1x16x1xf32>
    %106 = tpu.reciprocal %105 {approx = true} : vector<1x16x1xf32> -> vector<1x16x1xf32>
    %107 = vector.broadcast %106 : vector<1x16x1xf32> to vector<1x16x16xf32>
    %108 = arith.mulf %103, %107 : vector<1x16x16xf32>
    %109 = arith.addf %95, %108 : vector<1x16x16xf32>
    %cst_43 = arith.constant dense<0.000000e+00> : vector<1x16xf32>
    %110 = vector.multi_reduction <add>, %108, %cst_43 [1] : vector<1x16x16xf32> to vector<1x16xf32>
    %111 = vector.shape_cast %110 : vector<1x16xf32> to vector<1x1x16xf32>
    %cst_44 = arith.constant 1.600000e+01 : f32
    %112 = vector.broadcast %cst_44 : f32 to vector<1x1x16xf32>
    %113 = arith.divf %111, %112 : vector<1x1x16xf32>
    %c2 = arith.constant 2 : index
    %c0_45 = arith.constant 0 : index
    %c0_46 = arith.constant 0 : index
    %114 = vector.load %arg11[%c2, %c0_45, %c0_46] : memref<3x16x16xf32, #tpu.memory_space<vmem>>, vector<1x16x16xf32>
    %115 = vector.shape_cast %114 : vector<1x16x16xf32> to vector<16x16xf32>
    %116 = vector.shape_cast %115 : vector<16x16xf32> to vector<1x16x16xf32>
    %117 = arith.mulf %84, %116 : vector<1x16x16xf32>
    %cst_47 = arith.constant dense<0.000000e+00> : vector<1x16xf32>
    %118 = vector.multi_reduction <add>, %117, %cst_47 [2] : vector<1x16x16xf32> to vector<1x16xf32>
    %119 = vector.shape_cast %118 : vector<1x16xf32> to vector<1x16x1xf32>
    %120 = tpu.reciprocal %119 {approx = true} : vector<1x16x1xf32> -> vector<1x16x1xf32>
    %121 = vector.broadcast %120 : vector<1x16x1xf32> to vector<1x16x16xf32>
    %122 = arith.mulf %117, %121 : vector<1x16x16xf32>
    %123 = arith.addf %109, %122 : vector<1x16x16xf32>
    %cst_48 = arith.constant dense<0.000000e+00> : vector<1x16xf32>
    %124 = vector.multi_reduction <add>, %122, %cst_48 [1] : vector<1x16x16xf32> to vector<1x16xf32>
    %125 = vector.shape_cast %124 : vector<1x16xf32> to vector<1x1x16xf32>
    %cst_49 = arith.constant 1.600000e+01 : f32
    %126 = vector.broadcast %cst_49 : f32 to vector<1x1x16xf32>
    %127 = arith.divf %125, %126 : vector<1x1x16xf32>
    %128 = tpu.concatenate %99, %113, %127 in 1 : vector<1x1x16xf32>, vector<1x1x16xf32>, vector<1x1x16xf32> -> vector<1x3x16xf32>
    %129 = arith.truncf %128 : vector<1x3x16xf32> to vector<1x3x16xbf16>
    "tpu.trace_start"() <{level = 10 : i32, message = "bsl,blh->bsh"}> : () -> ()
    %cst_50 = arith.constant dense<0.000000e+00> : vector<1x3x128xf32>
    %130 = tpu.matmul %129, %78, %cst_50 {dimension_numbers = #tpu.dot_dimension_numbers<[2], [1], [1], [2], [0, 0, 0, 1, 1, 2], [0], [0]>} : vector<1x3x16xbf16>, vector<1x16x128xbf16>, vector<1x3x128xf32> -> vector<1x3x128xf32>
    "tpu.trace_stop"() : () -> ()
    %c0_51 = arith.constant 0 : index
    %c0_52 = arith.constant 0 : index
    %c0_53 = arith.constant 0 : index
    %131 = vector.load %arg15[%c0_51, %c0_52, %c0_53] : memref<1x3x128xf32, #tpu.memory_space<vmem>>, vector<1x3x128xf32>
    tpu.vector_store %arg15[%c0_51, %c0_52, %c0_53], %130 {strides = array<i32>} : memref<1x3x128xf32, #tpu.memory_space<vmem>>, vector<1x3x128xf32>,
    %cst_54 = arith.constant 0.333333343 : f32
    %132 = vector.broadcast %cst_54 : f32 to vector<1x16x16xf32>
    %133 = arith.mulf %123, %132 : vector<1x16x16xf32>
    %134 = arith.truncf %133 : vector<1x16x16xf32> to vector<1x16x16xbf16>
    "tpu.trace_start"() <{level = 10 : i32, message = "blm,bmh->blh"}> : () -> ()
    %cst_55 = arith.constant dense<0.000000e+00> : vector<1x16x128xf32>
    %135 = tpu.matmul %134, %78, %cst_55 {dimension_numbers = #tpu.dot_dimension_numbers<[2], [1], [1], [2], [0, 0, 0, 1, 1, 2], [0], [0]>} : vector<1x16x16xbf16>, vector<1x16x128xbf16>, vector<1x16x128xf32> -> vector<1x16x128xf32>
    "tpu.trace_stop"() : () -> ()
    %136 = vector.shape_cast %135 : vector<1x16x128xf32> to vector<16x128xf32>
    %137 = arith.truncf %136 : vector<16x128xf32> to vector<16x128xbf16>
    %c0_56 = arith.constant 0 : index
    %c0_57 = arith.constant 0 : index
    %138 = vector.load %arg10[%c0_56, %c0_57] : memref<128x128xbf16, #tpu.memory_space<vmem>>, vector<128x128xbf16>
    %cst_58 = arith.constant dense<0.000000e+00> : vector<16x128xf32>
    %139 = tpu.matmul %137, %138, %cst_58 {dimension_numbers = #tpu.dot_dimension_numbers<[1], [0], [0], [1], [0, 0, 1, 1], [], []>} : vector<16x128xbf16>, vector<128x128xbf16>, vector<16x128xf32> -> vector<16x128xf32>
    %140 = vector.shape_cast %139 : vector<16x128xf32> to vector<1x16x128xf32>
    %141 = arith.addf %63, %140 : vector<1x16x128xf32>
    %c0_59 = arith.constant 0 : index
    %c0_60 = arith.constant 0 : index
    %142 = vector.load %arg12[%c0_59, %c0_60] : memref<1x128xf32, #tpu.memory_space<vmem>>, vector<1x128xf32>
    %c0_61 = arith.constant 0 : index
    %c0_62 = arith.constant 0 : index
    %143 = vector.load %arg13[%c0_61, %c0_62] : memref<1x128xf32, #tpu.memory_space<vmem>>, vector<1x128xf32>
    %cst_63 = arith.constant dense<0.000000e+00> : vector<1x16xf32>
    %144 = vector.multi_reduction <add>, %141, %cst_63 [2] : vector<1x16x128xf32> to vector<1x16xf32>
    %145 = vector.shape_cast %144 : vector<1x16xf32> to vector<1x16x1xf32>
    %cst_64 = arith.constant 1.280000e+02 : f32
    %146 = vector.broadcast %cst_64 : f32 to vector<1x16x1xf32>
    %147 = arith.divf %145, %146 : vector<1x16x1xf32>
    %148 = vector.broadcast %147 : vector<1x16x1xf32> to vector<1x16x128xf32>
    %149 = arith.subf %141, %148 : vector<1x16x128xf32>
    %150 = arith.mulf %149, %149 : vector<1x16x128xf32>
    %cst_65 = arith.constant dense<0.000000e+00> : vector<1x16xf32>
    %151 = vector.multi_reduction <add>, %150, %cst_65 [2] : vector<1x16x128xf32> to vector<1x16xf32>
    %152 = vector.shape_cast %151 : vector<1x16xf32> to vector<1x16x1xf32>
    %cst_66 = arith.constant 1.280000e+02 : f32
    %153 = vector.broadcast %cst_66 : f32 to vector<1x16x1xf32>
    %154 = arith.divf %152, %153 : vector<1x16x1xf32>
    %155 = vector.broadcast %147 : vector<1x16x1xf32> to vector<1x16x128xf32>
    %156 = arith.subf %141, %155 : vector<1x16x128xf32>
    %cst_67 = arith.constant 9.99999996E-13 : f32
    %157 = vector.broadcast %cst_67 : f32 to vector<1x16x1xf32>
    %158 = arith.addf %154, %157 : vector<1x16x1xf32>
    %159 = math.rsqrt %158 : vector<1x16x1xf32>
    %160 = vector.broadcast %159 : vector<1x16x1xf32> to vector<1x16x128xf32>
    %161 = arith.mulf %156, %160 : vector<1x16x128xf32>
    %162 = vector.shape_cast %142 : vector<1x128xf32> to vector<1x1x128xf32>
    %163 = vector.broadcast %162 : vector<1x1x128xf32> to vector<1x16x128xf32>
    %164 = arith.mulf %161, %163 : vector<1x16x128xf32>
    %165 = vector.shape_cast %143 : vector<1x128xf32> to vector<1x1x128xf32>
    %166 = vector.broadcast %165 : vector<1x1x128xf32> to vector<1x16x128xf32>
    %167 = arith.addf %164, %166 : vector<1x16x128xf32>
    %c0_68 = arith.constant 0 : index
    %c0_69 = arith.constant 0 : index
    %c0_70 = arith.constant 0 : index
    %168 = vector.load %arg14[%c0_68, %c0_69, %c0_70] : memref<1x16x128xf32, #tpu.memory_space<vmem>>, vector<1x16x128xf32>
    tpu.vector_store %arg14[%c0_68, %c0_69, %c0_70], %167 {strides = array<i32>} : memref<1x16x128xf32, #tpu.memory_space<vmem>>, vector<1x16x128xf32>,
    %cst_71 = arith.constant dense<0.000000e+00> : vector<1x128xf32>
    %169 = vector.multi_reduction <add>, %167, %cst_71 [1] : vector<1x16x128xf32> to vector<1x128xf32>
    %170 = vector.shape_cast %169 : vector<1x128xf32> to vector<1x1x128xf32>
    %cst_72 = arith.constant 1.600000e+01 : f32
    %171 = vector.broadcast %cst_72 : f32 to vector<1x1x128xf32>
    %172 = arith.divf %170, %171 : vector<1x1x128xf32>
    %c0_73 = arith.constant 0 : index
    %c0_74 = arith.constant 0 : index
    %c0_75 = arith.constant 0 : index
    %173 = vector.load %arg16[%c0_73, %c0_74, %c0_75] : memref<1x1x128xf32, #tpu.memory_space<vmem>>, vector<1x1x128xf32>
    tpu.vector_store %arg16[%c0_73, %c0_74, %c0_75], %172 {strides = array<i32>} : memref<1x1x128xf32, #tpu.memory_space<vmem>>, vector<1x1x128xf32>,
    return
  }
  func.func @transform_0(%arg0: i32) -> (i32, i32, i32) {
    %c0_i32 = arith.constant 0 : i32
    %c0_i32_0 = arith.constant 0 : i32
    %c0_i32_1 = arith.constant 0 : i32
    return %arg0, %c0_i32, %c0_i32_0 : i32, i32, i32
  }
  func.func @transform_1(%arg0: i32) -> (i32, i32) {
    %c0_i32 = arith.constant 0 : i32
    %c0_i32_0 = arith.constant 0 : i32
    %c0_i32_1 = arith.constant 0 : i32
    return %c0_i32, %c0_i32_0 : i32, i32
  }
  func.func @transform_2(%arg0: i32) -> (i32, i32) {
    %c0_i32 = arith.constant 0 : i32
    %c0_i32_0 = arith.constant 0 : i32
    %c0_i32_1 = arith.constant 0 : i32
    return %c0_i32, %c0_i32_0 : i32, i32
  }
  func.func @transform_3(%arg0: i32) -> (i32, i32) {
    %c0_i32 = arith.constant 0 : i32
    %c0_i32_0 = arith.constant 0 : i32
    %c0_i32_1 = arith.constant 0 : i32
    return %c0_i32, %c0_i32_0 : i32, i32
  }
  func.func @transform_4(%arg0: i32) -> (i32, i32) {
    %c0_i32 = arith.constant 0 : i32
    %c0_i32_0 = arith.constant 0 : i32
    %c0_i32_1 = arith.constant 0 : i32
    return %c0_i32, %c0_i32_0 : i32, i32
  }
  func.func @transform_5(%arg0: i32) -> (i32, i32) {
    %c0_i32 = arith.constant 0 : i32
    %c0_i32_0 = arith.constant 0 : i32
    %c0_i32_1 = arith.constant 0 : i32
    return %c0_i32, %c0_i32_0 : i32, i32
  }
  func.func @transform_6(%arg0: i32) -> (i32, i32) {
    %c0_i32 = arith.constant 0 : i32
    %c0_i32_0 = arith.constant 0 : i32
    %c0_i32_1 = arith.constant 0 : i32
    return %c0_i32, %c0_i32_0 : i32, i32
  }
  func.func @transform_7(%arg0: i32) -> (i32, i32) {
    %c0_i32 = arith.constant 0 : i32
    %c0_i32_0 = arith.constant 0 : i32
    %c0_i32_1 = arith.constant 0 : i32
    return %c0_i32, %c0_i32_0 : i32, i32
  }
  func.func @transform_8(%arg0: i32) -> (i32, i32) {
    %c0_i32 = arith.constant 0 : i32
    %c0_i32_0 = arith.constant 0 : i32
    %c0_i32_1 = arith.constant 0 : i32
    return %c0_i32, %c0_i32_0 : i32, i32
  }
  func.func @transform_9(%arg0: i32) -> (i32, i32) {
    %c0_i32 = arith.constant 0 : i32
    %c0_i32_0 = arith.constant 0 : i32
    %c0_i32_1 = arith.constant 0 : i32
    return %c0_i32, %c0_i32_0 : i32, i32
  }
  func.func @transform_10(%arg0: i32) -> (i32, i32, i32) {
    %c0_i32 = arith.constant 0 : i32
    %c0_i32_0 = arith.constant 0 : i32
    %c0_i32_1 = arith.constant 0 : i32
    %c0_i32_2 = arith.constant 0 : i32
    return %c0_i32, %c0_i32_0, %c0_i32_1 : i32, i32, i32
  }
  func.func @transform_11(%arg0: i32) -> (i32, i32) {
    %c0_i32 = arith.constant 0 : i32
    %c0_i32_0 = arith.constant 0 : i32
    %c0_i32_1 = arith.constant 0 : i32
    return %c0_i32, %c0_i32_0 : i32, i32
  }
  func.func @transform_12(%arg0: i32) -> (i32, i32) {
    %c0_i32 = arith.constant 0 : i32
    %c0_i32_0 = arith.constant 0 : i32
    %c0_i32_1 = arith.constant 0 : i32
    return %c0_i32, %c0_i32_0 : i32, i32
  }
  func.func @transform_13(%arg0: i32) -> (i32, i32, i32) {
    %c0_i32 = arith.constant 0 : i32
    %c0_i32_0 = arith.constant 0 : i32
    %c0_i32_1 = arith.constant 0 : i32
    return %arg0, %c0_i32, %c0_i32_0 : i32, i32, i32
  }
  func.func @transform_14(%arg0: i32) -> (i32, i32, i32) {
    %c0_i32 = arith.constant 0 : i32
    %c0_i32_0 = arith.constant 0 : i32
    %c0_i32_1 = arith.constant 0 : i32
    return %arg0, %c0_i32, %c0_i32_0 : i32, i32, i32
  }
  func.func @transform_15(%arg0: i32) -> (i32, i32, i32) {
    %c0_i32 = arith.constant 0 : i32
    %c0_i32_0 = arith.constant 0 : i32
    %c0_i32_1 = arith.constant 0 : i32
    return %arg0, %c0_i32, %c0_i32_0 : i32, i32, i32
  }
}

</mosaic_0001>

<bundles_post_ra>
// kernel: tpu_custom_call.1
= control target key start
LH: loop header
LB: loop body
LE: loop exit
PB: predicated region body
PF: predicated region fallthrough
CT: control target
= control target key end

     0   :  { %s3025_s0 = inlined_call_operand.hbm [shape: f32[2,16,256], index: 0, kind: input, shape index: {}]   ;;  %s3026_s1 = inlined_call_operand.vmem [shape: f32[1,256], index: 1, kind: input, shape index: {}]   ;;  %s3027_s2 = inlined_call_operand.hbm [shape: f32[1,256], index: 2, kind: input, shape index: {}]   ;;  %s3028_s3 = inlined_call_operand.hbm [shape: bf16[256,128], index: 3, kind: input, shape index: {}]   ;;  %s3029_s4 = inlined_call_operand.hbm [shape: f32[1,128], index: 4, kind: input, shape index: {}]   ;;  %s3030_s5 = inlined_call_operand.vmem [shape: f32[16,128], index: 5, kind: input, shape index: {}]   ;;  %s3031_s6 = inlined_call_operand.vmem [shape: f32[1,128], index: 6, kind: input, shape index: {}]   ;;  %s3032_s7 = inlined_call_operand.vmem [shape: f32[1,128], index: 7, kind: input, shape index: {}]   ;;  %s3033_s8 = inlined_call_operand.hbm [shape: bf16[128,384], index: 8, kind: input, shape index: {}]   ;;  %s3034_s9 = inlined_call_operand.hbm [shape: bf16[128,128], index: 9, kind: input, shape index: {}]   ;;  %s3035_s10 = inlined_call_operand.hbm [shape: f32[3,16,16], index: 10, kind: input, shape index: {}]   ;;  %s3036_s11 = inlined_call_operand.vmem [shape: f32[1,128], index: 11, kind: input, shape index: {}]   ;;  %s3037_s12 = inlined_call_operand.vmem [shape: f32[1,128], index: 12, kind: input, shape index: {}]   ;;  %s3038_s13 = inlined_call_operand.hbm [shape: f32[2,16,128], index: 13, kind: output, shape index: {0}]   ;;  %s3039_s14 = inlined_call_operand.vmem [shape: f32[2,3,128], index: 14, kind: output, shape index: {1}]   ;;  %s3040_s15 = inlined_call_operand.hbm [shape: f32[2,1,128], index: 15, kind: output, shape index: {2}]  }
   0x1   :  { %3046 = sst [smem:[#allocation23_spill]] %s3027_s2 }
   0x2   :  { %3047 = sst [smem:[#allocation24_spill]] %s3029_s4 }
   0x3   :  { %3048 = sst [smem:[#allocation25_spill]] %s3031_s6 }
   0x4   :  { %3049 = sst [smem:[#allocation26_spill]] %s3032_s7 }
   0x5   :  { %3050 = sst [smem:[#allocation27_spill]] %s3036_s11 }
   0x6   :  { %3051 = sst [smem:[#allocation28_spill]] %s3037_s12 }
   0x7   :  { %3052 = sst [smem:[#allocation29_spill]] %s3038_s13 }
   0x8   :  { %3053 = sst [smem:[#allocation30_spill]] %s3039_s14 }
   0x9   :  { %3054 = sst [smem:[#allocation31_spill]] %s3040_s15 }
   0xa   :  { %21 = vsyncpa [#allocation3], 0 }
   0xb   :  { %23 = vsyncpa [#allocation3 + $0x1], 0 }
   0xc   :  { %24 = vsyncpa [#allocation6], 0 }
   0xd   :  { %25 = vsyncpa [#allocation9], 0 }
   0xe   :  { %26 = vsyncpa [#allocation12], 0 }
   0xf   :  { %27 = vsyncpa [#allocation4], 0 }
  0x10   :  { %29 = vsyncpa [#allocation4 + $0x1], 0 }
  0x11   :  { %30 = vsyncpa [#allocation16], 0 }
  0x12   :  { %32 = vsyncpa [#allocation16 + $0x1], 0  ;;  %s2581_s18 = smov 0   ;;  %s2583_s19 = smov 0  }
  0x13   :  { %s2585_s20 = smov 0   ;;  %s2587_s21 = smov 0  }
  0x14 LB: > { %s2479_s22 = smov [#allocation5]   ;;  %s2602_s24 = sadd.s32 4294967295, %s2477_s21   ;;  %s2477_s21 = sphi %s2587_s21, %s3086_s21   ;;  %s2473_s20 = sphi %s2585_s20, %s3085_s20   ;;  %s2469_s19 = sphi %s2583_s19, %s3084_s19   ;;  %s2465_s18 = sphi %s2581_s18, %s3083_s18  }
  0x15   : > { %s415_s23 = sshll.u32 %s2479_s22, 4  ;;  %p1772_p0 = scmp.ge.s32.totalorder %s2477_s21, 1  ;;  %s416_s23 = int_to_ptr.vmem [resolvable:$true] %s415_s23 }
  0x16   : > { %p3043_p1 = scmp.eq.s32.totalorder %s2602_s24, 0  ;;  %p399_p2 = scmp.lt.s32.totalorder %s2477_s21, 3 }
  0x17   : > { %s2480_s26 = smov [#allocation8]   ;;  %s2481_s29 = smov [#allocation11]  }
  0x18   : > { %p2607_p3 = pnand %p1772_p0, %p399_p2  ;;  %s439_s27 = sshll.u32 %s2480_s26, 4  ;;  %s2614_s27 = int_to_ptr.vmem [resolvable:$true] %s439_s27 }
  0x19   : > { %s471_s30 = sshll.u32 %s2481_s29, 4  ;;  %s3057_s2 = sld [smem:[#allocation23_spill]]  ;;  %s2622_s30 = int_to_ptr.vmem [resolvable:$true] %s471_s30 }
  0x1a   : > { %s3055_s25 = scalar_select %p2607_p3, 1, 0 }
  0x1b   : > { %p1990_p5 = pneg %p2607_p3 }
  0x1d   : > { %p2618_p6 = pnand %p1990_p5, %p3043_p1 }
  0x1f   : > { %s2169_s22 = scalar_lea.hbm %s3057_s2, 32  ;;  %p2632_p8 = pneg %p2618_p6 }
  0x20   : > { %p2170_p7 = scmp.ne.s32.totalorder %s3057_s2, %s2169_s22  ;;  %p2176_p11 = scmp.lt.u32.totalorder %s2169_s22, %s3057_s2 }
  0x22   : > { %p2172_p9 = pnand %p2632_p8, %p2170_p7 }
  0x24   : > { %p2173_p10 = pneg %p2172_p9 }
  0x26   : > { %p2178_p12 = pnand %p2176_p11, %p2173_p10 }
  0x28   : > { %2181 = shalt.err (!%p2178_p12)
}
  0x29   : > { %s2182_s16 = scalar_lea.vmem %s416_s23, 32  ;;  %p2190_p5 = scmp.lt.s32.totalorder %s416_s23, %s416_s23 }
  0x2a   : > { %p2183_p13 = scmp.ne.s32.totalorder %s416_s23, %s2182_s16  ;;  %p2191_p4 = scmp.lt.s32.totalorder %s2182_s16, %s2182_s16 }
  0x2c   : > { %p2185_p0 = pnand %p2183_p13, %p2632_p8  ;;  %p2192_p1 = por %p2191_p4, %p2190_p5 }
  0x2e   : > { %p2186_p2 = pneg %p2185_p0 }
  0x30   : > { %p2193_p3 = pnand %p2192_p1, %p2186_p2 }
  0x32   : > { %2196 = shalt.err (!%p2193_p3)
}
  0x33   : > { %1993 = dma.hbm_to_vmem [thread:$0]  (!%p2618_p6), %s3057_s2, 32, %s416_s23, [#allocation6]  }
  0x34   : > { %s3059_s4 = sld [smem:[#allocation24_spill]] }
  0x3a   : > { %s2197_s22 = scalar_lea.hbm %s3059_s4, 16 }
  0x3b   : > { %p2198_p7 = scmp.ne.s32.totalorder %s3059_s4, %s2197_s22  ;;  %p2204_p1 = scmp.lt.u32.totalorder %s2197_s22, %s3059_s4 }
  0x3d   : > { %p2200_p9 = pnand %p2198_p7, %p2632_p8 }
  0x3f   : > { %p2201_p4 = pneg %p2200_p9 }
  0x41   : > { %p2206_p3 = pnand %p2204_p1, %p2201_p4 }
  0x43   : > { %2209 = shalt.err (!%p2206_p3)
}
  0x44   : > { %s2210_s23 = scalar_lea.vmem %s2614_s27, 16  ;;  %s2217_s11 = scalar_lea.vmem %s2614_s27, 32 }
  0x45   : > { %p2211_p10 = scmp.ne.s32.totalorder %s2614_s27, %s2210_s23  ;;  %p2218_p13 = scmp.lt.s32.totalorder %s2614_s27, %s2614_s27 }
  0x46   : > { %p2219_p0 = scmp.lt.s32.totalorder %s2217_s11, %s2210_s23 }
  0x47   : > { %p2213_p11 = pnand %p2211_p10, %p2632_p8 }
  0x48   : > { %p2220_p2 = por %p2219_p0, %p2218_p13 }
  0x49   : > { %p2214_p12 = pneg %p2213_p11 }
  0x4b   : > { %p2221_p5 = pnand %p2220_p2, %p2214_p12 }
  0x4d   : > { %2224 = shalt.err (!%p2221_p5)
}
  0x4e   : > { %1999 = dma.hbm_to_vmem [thread:$0]  (!%p2618_p6), %s3059_s4, 16, %s2614_s27, [#allocation9]  }
  0x4f   : > { %s2225_s17 = scalar_lea.hbm %s3034_s9, 1024 }
  0x50   : > { %p2226_p7 = scmp.ne.s32.totalorder %s3034_s9, %s2225_s17  ;;  %p2232_p1 = scmp.lt.u32.totalorder %s2225_s17, %s3034_s9 }
  0x52   : > { %p2228_p9 = pnand %p2226_p7, %p2632_p8 }
  0x54   : > { %p2229_p4 = pneg %p2228_p9 }
  0x56   : > { %p2234_p3 = pnand %p2232_p1, %p2229_p4 }
  0x58   : > { %2237 = shalt.err (!%p2234_p3)
}
  0x59   : > { %s2238_s27 = scalar_lea.vmem %s2622_s30, 1024  ;;  %p2246_p13 = scmp.lt.s32.totalorder %s2622_s30, %s2622_s30 }
  0x5a   : > { %p2239_p10 = scmp.ne.s32.totalorder %s2622_s30, %s2238_s27  ;;  %p2247_p0 = scmp.lt.s32.totalorder %s2238_s27, %s2238_s27 }
  0x5c   : > { %p2241_p11 = pnand %p2239_p10, %p2632_p8  ;;  %p2248_p2 = por %p2247_p0, %p2246_p13 }
  0x5e   : > { %p2242_p12 = pneg %p2241_p11 }
  0x60   : > { %p2249_p5 = pnand %p2248_p2, %p2242_p12 }
  0x62   : > { %2252 = shalt.err (!%p2249_p5)
}
  0x63   : > { %s2482_s11 = smov 64   ;;  %s2483_s14 = smov 4  }
  0x64   : > { %2005 = dma.hbm_to_vmem [thread:$0]  (!%p2618_p6), %s3034_s9, 1024, %s2622_s30, [#allocation12], %s2482_s11, %s2482_s11, %s2483_s14  }
  0x65   : > { %s2484_s12 = smov [#allocation7]   ;;  %s2485_s22 = smov [#allocation10]  }
  0x66   : > { %s425_s17 = sshll.u32 %s2484_s12, 4  ;;  %s458_s29 = sshll.u32 %s2485_s22, 4  ;;  %s426_s17 = int_to_ptr.vmem [resolvable:$true] %s425_s17  ;;  %s459_s29 = int_to_ptr.vmem [resolvable:$true] %s458_s29 }
  0x67   : > { %s2253_s27 = scalar_lea.hbm %s3028_s3, 2048 }
  0x68   : > { %p2254_p7 = scmp.ne.s32.totalorder %s3028_s3, %s2253_s27  ;;  %p2260_p1 = scmp.lt.u32.totalorder %s2253_s27, %s3028_s3 }
  0x6a   : > { %p2256_p9 = pnand %p2254_p7, %p2632_p8 }
  0x6c   : > { %p2257_p4 = pneg %p2256_p9 }
  0x6e   : > { %p2262_p3 = pnand %p2260_p1, %p2257_p4 }
  0x70   : > { %2265 = shalt.err (!%p2262_p3)
}
  0x71   : > { %s2266_s30 = scalar_lea.vmem %s426_s17, 2048  ;;  %p2274_p13 = scmp.lt.s32.totalorder %s426_s17, %s426_s17 }
  0x72   : > { %p2267_p10 = scmp.ne.s32.totalorder %s426_s17, %s2266_s30  ;;  %p2275_p0 = scmp.lt.s32.totalorder %s2266_s30, %s2266_s30 }
  0x74   : > { %p2269_p11 = pnand %p2267_p10, %p2632_p8  ;;  %p2276_p2 = por %p2275_p0, %p2274_p13 }
  0x76   : > { %p2270_p12 = pneg %p2269_p11 }
  0x78   : > { %p2277_p5 = pnand %p2276_p2, %p2270_p12 }
  0x7a   : > { %2280 = shalt.err (!%p2277_p5)
}
  0x7b   : > { %1996 = dma.hbm_to_vmem [thread:$0]  (!%p2618_p6), %s3028_s3, 2048, %s426_s17, [#allocation6], %s2482_s11, %s2482_s11, %s2483_s14  }
  0x7c   : > { %s2281_s13 = scalar_lea.hbm %s3033_s8, 3072 }
  0x7d   : > { %p2282_p7 = scmp.ne.s32.totalorder %s3033_s8, %s2281_s13  ;;  %p2288_p1 = scmp.lt.u32.totalorder %s2281_s13, %s3033_s8 }
  0x7f   : > { %p2284_p9 = pnand %p2282_p7, %p2632_p8 }
  0x81   : > { %p2285_p4 = pneg %p2284_p9 }
  0x83   : > { %p2290_p3 = pnand %p2288_p1, %p2285_p4 }
  0x85   : > { %2293 = shalt.err (!%p2290_p3)
}
  0x86   : > { %s2294_s23 = scalar_lea.vmem %s459_s29, 3072  ;;  %p2302_p13 = scmp.lt.s32.totalorder %s459_s29, %s459_s29 }
  0x87   : > { %p2295_p10 = scmp.ne.s32.totalorder %s459_s29, %s2294_s23  ;;  %p2303_p0 = scmp.lt.s32.totalorder %s2294_s23, %s2294_s23 }
  0x89   : > { %p2297_p11 = pnand %p2295_p10, %p2632_p8  ;;  %p2304_p2 = por %p2303_p0, %p2302_p13 }
  0x8b   : > { %p2298_p12 = pneg %p2297_p11 }
  0x8d   : > { %p2305_p5 = pnand %p2304_p2, %p2298_p12 }
  0x8f   : > { %2308 = shalt.err (!%p2305_p5)
}
  0x90   : > { %s2486_s11 = smov 192   ;;  %s2487_s14 = smov 12  }
  0x91   : > { %2002 = dma.hbm_to_vmem [thread:$0]  (!%p2618_p6), %s3033_s8, 3072, %s459_s29, [#allocation9], %s2486_s11, %s2486_s11, %s2487_s14  }
  0x92   : > { %s2488_s30 = smov [#allocation13]   ;;  %s2309_s7 = scalar_lea.hbm %s3035_s10, 768 }
  0x93   : > { %s484_s2 = sshll.u32 %s2488_s30, 4  ;;  %p2310_p7 = scmp.ne.s32.totalorder %s3035_s10, %s2309_s7  ;;  %s485_s2 = int_to_ptr.vmem [resolvable:$true] %s484_s2 }
  0x94   : > { %p2316_p1 = scmp.lt.u32.totalorder %s2309_s7, %s3035_s10 }
  0x95   : > { %p2312_p9 = pnand %p2310_p7, %p2632_p8 }
  0x97   : > { %p2313_p4 = pneg %p2312_p9 }
  0x99   : > { %p2318_p3 = pnand %p2316_p1, %p2313_p4 }
  0x9b   : > { %2321 = shalt.err (!%p2318_p3)
}
  0x9c   : > { %s2322_s29 = scalar_lea.vmem %s485_s2, 768  ;;  %p2330_p13 = scmp.lt.s32.totalorder %s485_s2, %s485_s2 }
  0x9d   : > { %p2323_p10 = scmp.ne.s32.totalorder %s485_s2, %s2322_s29  ;;  %p2331_p0 = scmp.lt.s32.totalorder %s2322_s29, %s2322_s29 }
  0x9f   : > { %p2325_p11 = pnand %p2323_p10, %p2632_p8  ;;  %p2332_p2 = por %p2331_p0, %p2330_p13 }
  0xa1   : > { %p2326_p12 = pneg %p2325_p11 }
  0xa3   : > { %p2333_p5 = pnand %p2332_p2, %p2326_p12 }
  0xa5   : > { %2336 = shalt.err (!%p2333_p5)
}
  0xa6   : > { %s2489_s16 = smov 128   ;;  %s2490_s26 = smov 8  }
  0xa7   : > { %2008 = dma.hbm_to_vmem [thread:$0]  (!%p2618_p6), %s3035_s10, 768, %s485_s2, [#allocation12], %s2489_s16, %s2489_s16, %s2490_s26  }
  0xa8   : > { %s1771_s14 = sadd.s32 4294967294, %s2477_s21   ;;  %s2751_s17 = sadd.s32 1, %s2477_s21  }
  0xa9   : > { %s42_s27 = ssub.s32 %s2477_s21, %s2751_s17  ;;  %s45_s30 = sadd.s32 1, %s2473_s20 }
  0xaa   : > { %p43_p8 = scmp.eq.s32.totalorder %s42_s27, 0  ;;  %p52_p7 = scmp.ne.s32.totalorder %s2473_s20, %s2469_s19 }
  0xab   : > { %p53_p9 = scmp.eq.s32.totalorder %s2477_s21, 0  ;;  %p58_p4 = scmp.ne.s32.totalorder %s2469_s19, %s2465_s18 }
  0xac   : > { %s2762_s4 = scalar_select %p43_p8, %s2473_s20, %s45_s30  }
  0xad   : > { %p2764_p1 = por %p53_p9, %p52_p7  ;;  %p3061_p3 = scmp.eq.s32.totalorder %s2602_s24, 0 }
  0xae   : > { %p334_p10 = scmp.eq.s32.totalorder %s2602_s24, 1  ;;  %p340_p11 = scmp.eq.s32.totalorder %s1771_s14, 1 }
  0xaf   : > { %p2770_p6 = por %p3061_p3, %p58_p4  ;;  %p2026_p12 = scmp.lt.s32.totalorder %s2477_s21, 2 }
  0xb0   : > { %s504_s6 = sand.u32 1, %s2473_s20   ;;  %p2777_p13 = por %p334_p10, %p52_p7 }
  0xb1   : > { %p2781_p0 = por %p340_p11, %p58_p4  ;;  %s1780_s15 = sshll.u32 %s504_s6, 5 }
  0xb2   : > { %s3063_s7 = scalar_select %p2777_p13, 1, 0 }
  0xb3   : > { %s3064_s13 = scalar_select %p2781_p0, 1, 0 }
  0xb4   : > { %s1854_s12 = sshll.u32 %s2477_s21, 9  ;;  %s508_s26 = scalar_lea.vmem [#allocation2], %s1780_s15 }
  0xb5   : > { %s2789_s16 = scalar_lea.hbm %s3025_s0, %s1854_s12  ;;  %s515_s23 = sshll.u32 %s508_s26, 4  ;;  %s2791_s23 = int_to_ptr.vmem [resolvable:$true] %s515_s23 }
  0xb6   : > { %p2795_p2 = pnand %p2026_p12, %p2764_p1  ;;  %s2799_s14 = scalar_lea.sflag [#allocation3], %s504_s6 }
  0xb7   : > { %s2337_s27 = scalar_lea.hbm %s2789_s16, 512  ;;  %s2342_s28 = scalar_lea.hbm %s3025_s0, 1024 }
  0xb8   : > { %p2338_p5 = scmp.ne.s32.totalorder %s2789_s16, %s2337_s27  ;;  %p2339_p8 = pneg %p2795_p2 }
  0xb9   : > { %p2343_p4 = scmp.lt.u32.totalorder %s2789_s16, %s3025_s0  ;;  %p2344_p1 = scmp.lt.u32.totalorder %s2342_s28, %s2337_s27 }
  0xba   : > { %p2340_p7 = pnand %p2339_p8, %p2338_p5  ;;  %p2346_p10 = scmp.lt.u32.totalorder %s2337_s27, %s2789_s16 }
  0xbb   : > { %p2345_p3 = por %p2344_p1, %p2343_p4 }
  0xbc   : > { %p2341_p9 = pneg %p2340_p7 }
  0xbd   : > { %p2347_p11 = por %p2346_p10, %p2345_p3 }
  0xbf   : > { %p2348_p12 = pnand %p2347_p11, %p2341_p9 }
  0xc1   : > { %2351 = shalt.err (!%p2348_p12)
}
  0xc2   : > { %s2352_s6 = scalar_lea.vmem %s2791_s23, 512  ;;  %s2491_s29 = smov [#allocation2]  }
  0xc3   : > { %p2353_p5 = scmp.ne.s32.totalorder %s2791_s23, %s2352_s6  ;;  %s2357_s26 = sshll.u32 %s2491_s29, 4  ;;  %s2358_s26 = int_to_ptr.vmem [resolvable:$false] %s2357_s26 }
  0xc4   : > { %s2359_s30 = scalar_lea.vmem %s2358_s26, 1024  ;;  %p2360_p13 = scmp.lt.s32.totalorder %s2791_s23, %s2358_s26 }
  0xc5   : > { %p2355_p7 = pnand %p2353_p5, %p2339_p8  ;;  %p2361_p4 = scmp.lt.s32.totalorder %s2359_s30, %s2352_s6 }
  0xc7   : > { %p2356_p0 = pneg %p2355_p7  ;;  %p2362_p1 = por %p2361_p4, %p2360_p13 }
  0xc9   : > { %p2363_p3 = pnand %p2362_p1, %p2356_p0 }
  0xcb   : > { %2366 = shalt.err (!%p2363_p3)
}
  0xcc   : > { %s2492_s27 = smov 256   ;;  %s2493_s15 = smov 16  }
  0xcd   : > { %2012 = dma.hbm_to_vmem [thread:$0]  (!%p2795_p2), %s2789_s16, 512, %s2791_s23, %s2799_s14, %s2492_s27, %s2492_s27, %s2493_s15  }
  0xce   : > { %p3066_p8 = scmp.ne.s32.totalorder %s3055_s25, 0 }
  0xcf   : > { %s2830_s28 = sand.u32 (!%p3066_p8), 1, %s2469_s19  }
  0xd0   : > { %527 = sbr.rel (%p3066_p8) target bundleno = 2659 (0xa63), region = 72  ;;  %s1784_s12 = sshll.u32 (!%p3066_p8), %s2830_s28, 5 }
  0xd1   : > { %s530_s22 = scalar_lea.sflag (!%p3066_p8), [#allocation3], %s2830_s28  ;;  %s533_s6 = scalar_lea.vmem (!%p3066_p8), [#allocation2], %s1784_s12 }
  0xd7   : > { %2440 = dma.done.wait (%p2770_p6), %s530_s22, 512  }
  0xd8   : > { %2442 = vsyncadd (%p2770_p6), %s530_s22, 4294966784  ;;  %p3067_p13 = scmp.eq.s32.totalorder %s2602_s24, 0 }
  0xda   : > { %2444 = dma.done.wait (%p3067_p13), [#allocation6], 2080   ;;  %p3068_p0 = pmov %p3067_p13 }
  0xdc   : > { %2446 = vsyncadd (%p3068_p0), [#allocation6], 4294965216  ;;  %p3069_p2 = pmov %p3068_p0 }
  0xdd   : > { %p3070_p9 = pmov %p3068_p0 }
  0xde   : > { %2448 = dma.done.wait (%p3069_p2), [#allocation9], 3088  }
  0xdf   : > { %2450 = vsyncadd (%p3070_p9), [#allocation9], 4294964208  ;;  %p3071_p10 = pmov %p3068_p0 }
  0xe0   : > { %p3072_p11 = pmov %p3068_p0 }
  0xe1   : > { %2452 = dma.done.wait (%p3071_p10), [#allocation12], 1792  }
  0xe2   : > { %2454 = vsyncadd (%p3072_p11), [#allocation12], 4294965504  ;;  %v617_v0 = vld [vmem:[%s533_s6] sm:$0xff]  ;;  %v618_v1 = vld [vmem:[%s533_s6 + $0x8] sm:$0xff]  ;;  %v657_v40 = vlaneseq  ;;  %vm2496_vm0 = vmmov 0   ;;  %s3073_s30 = sld [smem:[#allocation25_spill]] }
  0xe3   : > { %v619_v2 = vld [vmem:[%s533_s6 + $0x10] sm:$0xff]  ;;  %v623_v3 = vadd.f32 %v618_v1, %v617_v0  ;;  %v620_v4 = vld [vmem:[%s533_s6 + $0x18] sm:$0xff]  ;;  %v2085_v6 = vld [vmem:[#allocation7 + $0x40] sm:$0xff]   ;;  %s3074_s12 = sld [smem:[#allocation26_spill]]  ;;  %vm1202_vm1 = vcmask 130048   ;;  %vm1296_vm2 = vcmask 1040384  }
  0xe4   : > { %v626_v5 = vadd.f32 %v620_v4, %v619_v2  ;;  %v2086_v7 = vld [vmem:[#allocation7] sm:$0xff]   ;;  %1856 = vmatprep.subr.bf16.mxu0 %v2085_v6  ;;  %v2087_v22 = vld [vmem:[#allocation7 + $0x48] sm:$0xff]   ;;  %v2089_v24 = vld [vmem:[#allocation7 + $0x50] sm:$0xff]   ;;  %v658_v43 = vshrl.u32 %v657_v40, 7  ;;  %vm1298_vm3 = vcmask 1041408   ;;  %p612_p6 = scmp.lt.s32.totalorder %s2602_s24, 1 }
  0xe5   : > { %624 = vadd.xlane.f32.xlu0 %v623_v3  ;;  %1857 = vmatpush3.bf16.msra.mxu0 %v2086_v7  ;;  %v2088_v23 = vld [vmem:[#allocation7 + $0x8] sm:$0xff]   ;;  %v2090_v25 = vld [vmem:[#allocation7 + $0x10] sm:$0xff]   ;;  %v2091_v26 = vld [vmem:[#allocation7 + $0x58] sm:$0xff]   ;;  %s3075_s16 = sld [smem:[#allocation30_spill]]  ;;  %s1791_s11 = sshll.u32 %s2830_s28, 4 }
  0xe6   : > { %1858 = vmatprep.subr.bf16.mxu0 %v2087_v22  ;;  %v2092_v27 = vld [vmem:[#allocation7 + $0x18] sm:$0xff]   ;;  %v2093_v28 = vld [vmem:[#allocation7 + $0x60] sm:$0xff]   ;;  %v2095_v30 = vld [vmem:[#allocation7 + $0x68] sm:$0xff]   ;;  %v659_v44 = vsub.s32 0, %v658_v43  ;;  %v663_v45 = vsub.s32 1, %v658_v43  ;;  %s613_s22 = scalar_select %p612_p6, %s2602_s24, 1 }
  0xe7   : > { %v2094_v29 = vld [vmem:[#allocation7 + $0x20] sm:$0xff]   ;;  %v2096_v31 = vld [vmem:[#allocation7 + $0x28] sm:$0xff]   ;;  %v2097_v32 = vld [vmem:[#allocation7 + $0x70] sm:$0xff]   ;;  %s3076_s26 = sld [smem:[#allocation27_spill]]  ;;  %s3077_s15 = sld [smem:[#allocation28_spill]] }
  0xe8   : > { %v2098_v33 = vld [vmem:[#allocation7 + $0x30] sm:$0xff]   ;;  %v2099_v34 = vld [vmem:[#allocation7 + $0x78] sm:$0xff]   ;;  %s1792_s6 = sshll.u32 %s613_s22, 2  ;;  %s599_s22 = scalar_lea.vmem [#allocation14], %s1791_s11 }
  0xe9   : > { %627 = vadd.xlane.f32.xlu0 %v626_v5  ;;  %1859 = vmatpush3.bf16.msra.mxu0 %v2088_v23  ;;  %v2100_v35 = vld [vmem:[#allocation7 + $0x38] sm:$0xff]   ;;  %v1793_v5 = vld [vmem:[#allocation8] ss:$0 sm:$0xff]  ;;  %v2117_v40 = vld [vmem:[#allocation10 + $0x64] ss:$12 sps:$4 sm:$0xff]   ;;  %s1552_s14 = scalar_lea.sflag [#allocation4], %s2830_s28 }
  0xea   : > { %1860 = vmatprep.subr.bf16.mxu0 %v2089_v24  ;;  %v621_v46 = vld [vmem:[%s3026_s1] sm:$0x3]  ;;  %v2104_v22 = vld [vmem:[#allocation10 + $0x8] ss:$12 sps:$4 sm:$0xff]   ;;  %v2107_v24 = vld [vmem:[#allocation10 + $0x18] ss:$12 sps:$4 sm:$0xff]  }
  0xeb   : > { %v622_v48 = vld [vmem:[#allocation5] sm:$0x3]  ;;  %v660_v50 = vrot.slane %v621_v46, %v659_v44  ;;  %v664_v51 = vrot.slane %v621_v46, %v663_v45  ;;  %v2125_v46 = vld [vmem:[#allocation10 + $0x94] ss:$12 sps:$4 sm:$0xff]   ;;  %s615_s23 = scalar_lea.vmem %s3075_s16, %s1792_s6  ;;  %s1573_s6 = sshll.u32 %s599_s22, 4  ;;  %s2950_s6 = int_to_ptr.vmem [resolvable:$true] %s1573_s6 }
  0xec   : > { %v675_v54 = vrot.slane %v622_v48, %v659_v44  ;;  %v679_v55 = vrot.slane %v622_v48, %v663_v45  ;;  %v2105_v23 = vld [vmem:[#allocation10 + $0x1c] ss:$12 sps:$4 sm:$0xff]   ;;  %v2123_v44 = vld [vmem:[#allocation10 + $0x78] ss:$12 sps:$4 sm:$0xff]   ;;  %v2124_v45 = vld [vmem:[#allocation10 + $0x80] ss:$12 sps:$4 sm:$0xff]  }
  0xed   : > { %1861 = vmatpush3.bf16.msra.mxu0 %v2090_v25  ;;  %v2108_v25 = vld [vmem:[#allocation10 + $0x20] ss:$12 sps:$4 sm:$0xff]   ;;  %v2121_v43 = vld [vmem:[#allocation10 + $0x7c] ss:$12 sps:$4 sm:$0xff]   ;;  %s3078_s16 = sld [smem:[#allocation29_spill]]  ;;  %s2367_s29 = scalar_lea.vmem %s2950_s6, 256 }
  0xee   : > { %1862 = vmatprep.subr.bf16.mxu0 %v2091_v26  ;;  %v2127_v48 = vld [vmem:[#allocation10 + $0x90] ss:$12 sps:$4 sm:$0xff]   ;;  %p2368_p12 = scmp.ne.s32.totalorder %s2950_s6, %s2367_s29  ;;  %p3079_p5 = scmp.ne.s32.totalorder %s3063_s7, 0 }
  0xef   : > { %s2497_s11 = smov [#allocation14]  }
  0xf0   : > { %p2369_p7 = pnand %p2368_p12, %p3079_p5 }
  0xf1   : > { %1863 = vmatpush3.bf16.msra.mxu0 %v2092_v27 }
  0xf2   : > { %1864 = vmatprep.subr.bf16.mxu0 %v2093_v28  ;;  %p2370_p4 = pneg %p2369_p7 }
  0xf5   : > { %1865 = vmatpush3.bf16.msra.mxu0 %v2094_v29 }
  0xf6   : > { %1866 = vmatprep.subr.bf16.mxu0 %v2095_v30 }
  0xf9   : > { %1867 = vmatpush3.bf16.msra.mxu0 %v2096_v31 }
  0xfa   : > { %1868 = vmatprep.subr.bf16.mxu0 %v2097_v32 }
  0xfd   : > { %1869 = vmatpush3.bf16.msra.mxu0 %v2098_v33 }
  0xfe   : > { %1870 = vmatprep.subr.bf16.mxu0 %v2099_v34  ;;  %v2109_v34 = vld [vmem:[#allocation10 + $0x34] ss:$12 sps:$4 sm:$0xff]  }
 0x101   : > { %1871 = vmatpush3.bf16.msra.mxu0 %v2100_v35  ;;  %v2111_v35 = vld [vmem:[#allocation10 + $0x30] ss:$12 sps:$4 sm:$0xff]  }
 0x172   : > { %v625_v8 = vpop.xlane.xlu0 %624 }
 0x173   : > { %v630_v9 = vmul.f32 0.00390625, %v625_v8 }
 0x175   : > { %v632_v10 = vsub.f32 %v617_v0, %v630_v9  ;;  %v633_v11 = vsub.f32 %v618_v1, %v630_v9 }
 0x176   : > { %v628_v12 = vpop.xlane.xlu0 %627 }
 0x177   : > { %v631_v13 = vmul.f32 0.00390625, %v628_v12  ;;  %v636_v14 = vmul.f32 %v632_v10, %v632_v10  ;;  %v637_v15 = vmul.f32 %v633_v11, %v633_v11  ;;  %v866_v12 = vld [vmem:[%s3030_s5] sm:$0xff] }
 0x179   : > { %v634_v16 = vsub.f32 %v619_v2, %v631_v13  ;;  %v635_v17 = vsub.f32 %v620_v4, %v631_v13  ;;  %v640_v18 = vadd.f32 %v637_v15, %v636_v14  ;;  %v867_v15 = vld [vmem:[%s3030_s5 + $0x8] sm:$0xff] }
 0x17b   : > { %641 = vadd.xlane.f32.xlu1 %v640_v18  ;;  %v638_v19 = vmul.f32 %v634_v16, %v634_v16  ;;  %v639_v20 = vmul.f32 %v635_v17, %v635_v17 }
 0x17d   : > { %v643_v21 = vadd.f32 %v639_v20, %v638_v19  ;;  %v2101_v19 = vld [vmem:[#allocation10 + $0x4] ss:$12 sps:$4 sm:$0xff]   ;;  %v2103_v20 = vld [vmem:[#allocation10] ss:$12 sps:$4 sm:$0xff]  }
 0x17e   : > { %1072 = vmatprep.subr.bf16.mxu1 %v2101_v19 }
 0x17f   : > { %644 = vadd.xlane.f32.xlu1 %v643_v21  ;;  %v2494_v21 = vmov 0.0   ;;  %1073 = vmatpush1.bf16.msra.mxu1 %v2103_v20 }
 0x180   : > { %1902 = vmatprep.subr.bf16.mxu0 %v2494_v21  ;;  %1074 = vmatprep.subr.bf16.mxu1 %v2105_v23 }
 0x183   : > { %1075 = vmatpush1.bf16.msra.mxu1 %v2107_v24 }
 0x184   : > { %1076 = vmatprep.subr.bf16.mxu1 %v2109_v34  ;;  %v1216_v34 = vld [vmem:[#allocation13 + $0x8] sm:$0xff] }
 0x187   : > { %1077 = vmatpush1.bf16.msra.mxu1 %v2111_v35  ;;  %v1243_v35 = vld [vmem:[#allocation13 + $0x10] sm:$0xff] }
 0x208   : > { %v642_v36 = vpop.xlane.xlu1 %641 }
 0x209   : > { %v646_v37 = vmul.f32 0.00390625, %v642_v36  ;;  %v2112_v36 = vld [vmem:[#allocation10 + $0x38] ss:$12 sps:$4 sm:$0xff]  }
 0x20b   : > { %v648_v38 = vadd.f32 1e-05, %v646_v37  ;;  %v2113_v37 = vld [vmem:[#allocation10 + $0x4c] ss:$12 sps:$4 sm:$0xff]  }
 0x20c   : > { %v645_v39 = vpop.xlane.xlu1 %644  ;;  %1078 = vmatprep.subr.bf16.mxu1 %v2113_v37 }
 0x20d   : > { %2141 = vrsqrt.f32 %v648_v38  ;;  %v647_v41 = vmul.f32 0.00390625, %v645_v39  ;;  %v2115_v38 = vld [vmem:[#allocation10 + $0x48] ss:$12 sps:$4 sm:$0xff]   ;;  %v2116_v39 = vld [vmem:[#allocation10 + $0x50] ss:$12 sps:$4 sm:$0xff]  }
 0x20e   : > { %1079 = vmatpush1.bf16.msra.mxu1 %v2115_v38  ;;  %v1244_v38 = vld [vmem:[#allocation13 + $0x18] sm:$0xff] }
 0x20f   : > { %v649_v42 = vadd.f32 1e-05, %v647_v41  ;;  %v2119_v41 = vld [vmem:[#allocation10 + $0x60] ss:$12 sps:$4 sm:$0xff]   ;;  %1080 = vmatprep.subr.bf16.mxu1 %v2117_v40 }
 0x211   : > { %2143 = vrsqrt.f32 %v649_v42  ;;  %v2120_v42 = vld [vmem:[#allocation10 + $0x68] ss:$12 sps:$4 sm:$0xff]  }
 0x212   : > { %1081 = vmatpush1.bf16.msra.mxu1 %v2119_v41 }
 0x213   : > { %1082 = vmatprep.subr.bf16.mxu1 %v2121_v43 }
 0x216   : > { %1083 = vmatpush1.bf16.msra.mxu1 %v2123_v44 }
 0x217   : > { %v2142_v47 = vpop.eup %2141  ;;  %1084 = vmatprep.subr.bf16.mxu1 %v2125_v46 }
 0x218   : > { %v653_v49 = vmul.f32 %v2142_v47, %v633_v11  ;;  %v652_v52 = vmul.f32 %v2142_v47, %v632_v10  ;;  %v2495_v47 = vmov 0  }
 0x219   : > { %1104 = vmatprep.mubr.bf16.mxu1 %v2495_v47 }
 0x21a   : > { %v668_v57 = vmul.f32 %v664_v51, %v653_v49  ;;  %v667_v59 = vmul.f32 %v660_v50, %v652_v52  ;;  %v2128_v49 = vld [vmem:[#allocation10 + $0x98] ss:$12 sps:$4 sm:$0xff]   ;;  %1085 = vmatpush1.bf16.msra.mxu1 %v2127_v48  ;;  %v2132_v52 = vld [vmem:[#allocation10 + $0xb0] ss:$12 sps:$4 sm:$0xff]  }
 0x21b   : > { %v2144_v53 = vpop.eup %2143 }
 0x21c   : > { %v655_v56 = vmul.f32 %v2144_v53, %v635_v17  ;;  %v654_v58 = vmul.f32 %v2144_v53, %v634_v16  ;;  %v683_v62 = vadd.f32 %v679_v55, %v668_v57  ;;  %v682_v0 = vadd.f32 %v675_v54, %v667_v59 }
 0x21e   : > { %v670_v60 = vmul.f32 %v664_v51, %v655_v56  ;;  %v669_v61 = vmul.f32 %v660_v50, %v654_v58  ;;  %v2129_v50 = vld [vmem:[#allocation10 + $0xac] ss:$12 sps:$4 sm:$0xff]   ;;  %v2131_v51 = vld [vmem:[#allocation10 + $0xa8] ss:$12 sps:$4 sm:$0xff]  }
 0x21f   : > { %1086 = vmatprep.subr.bf16.mxu1 %v2129_v50 }
 0x220   : > { %v685_v63 = vadd.f32 %v679_v55, %v670_v60  ;;  %v684_v1 = vadd.f32 %v675_v54, %v669_v61  ;;  %1087 = vmatpush1.bf16.msra.mxu1 %v2131_v51  ;;  %v1810_v60 = vld [vmem:[%s3073_s30] ss:$0 sm:$0xff] }
 0x221   : > { %1928 = vmatprep.subr.bf16.mxu1 %v2494_v21 }
 0x222   : > { %v687_v2 = vpack.c.bf16 %v685_v63, %v683_v62  ;;  %v686_v3 = vpack.c.bf16 %v684_v1, %v682_v0  ;;  %v1811_v1 = vld [vmem:[%s3074_s12] ss:$0 sm:$0xff]  ;;  %s1855_s12 = sshll.u32 %s2602_s24, 8 }
 0x224   : > { %855 = vmatprep.mubr.bf16.mxu0 %v687_v2 }
 0x225   : > { %856 = vmatmul.mubr.bf16.vlgmr.msra.gmra.mrb[0].mxu0 %v686_v3 }
 0x226   : > { %1903 = vmatpush3.bf16.msra.mxu0 %v2104_v22  ;;  %1918 = vmatprep.mubr.msk.bf16.mxu0 %vm2496_vm0, %v2494_v21 }
 0x227   : > { %1904 = vmatprep.subr.bf16.mxu0 %v2494_v21 }
 0x22a   : > { %1905 = vmatpush3.bf16.msra.mxu0 %v2108_v25 }
 0x22b   : > { %1906 = vmatprep.subr.bf16.mxu0 %v2494_v21 }
 0x22e   : > { %1907 = vmatpush3.bf16.msra.mxu0 %v2112_v36 }
 0x22f   : > { %1908 = vmatprep.subr.bf16.mxu0 %v2494_v21 }
 0x232   : > { %1909 = vmatpush3.bf16.msra.mxu0 %v2116_v39 }
 0x233   : > { %1910 = vmatprep.subr.bf16.mxu0 %v2494_v21 }
 0x236   : > { %1911 = vmatpush3.bf16.msra.mxu0 %v2120_v42  ;;  %v1270_v42 = vld [vmem:[#allocation13 + $0x20] sm:$0xff] }
 0x237   : > { %1912 = vmatprep.subr.bf16.mxu0 %v2494_v21 }
 0x23a   : > { %1913 = vmatpush3.bf16.msra.mxu0 %v2124_v45  ;;  %v1271_v45 = vld [vmem:[#allocation13 + $0x28] sm:$0xff] }
 0x23b   : > { %1914 = vmatprep.subr.bf16.mxu0 %v2494_v21 }
 0x23e   : > { %1915 = vmatpush3.bf16.msra.mxu0 %v2128_v49 }
 0x23f   : > { %1916 = vmatprep.subr.bf16.mxu0 %v2494_v21 }
 0x242   : > { %1917 = vmatpush3.bf16.msra.mxu0 %v2132_v52 }
 0x243   : > { %1922 = vmatprep.subr.bf16.mxu0 %v2494_v21 }
 0x2f8   : > { %v1872_v4 = vpop.f32.mrb[0].mxu0 }
 0x2f9   : > { %v1873_v6 = vpop.f32.mrb[1].mxu0 }
 0x2fa   : > { %v1874_v7 = vadd.f32 %v1873_v6, %v1872_v4  ;;  %v1875_v8 = vpop.f32.mrb[2].mxu0 }
 0x2fb   : > { %v1876_v9 = vpop.f32.mrb[3].mxu0 }
 0x2fc   : > { %v858_v10 = vadd.f32 %v1874_v7, %v1793_v5  ;;  %v1877_v11 = vadd.f32 %v1876_v9, %v1875_v8 }
 0x2fe   : > { %v864_v13 = vmax.f32 %v858_v10, 0.0  ;;  %v861_v14 = vadd.f32 %v1877_v11, %v1793_v5 }
 0x300   : > { %v865_v16 = vmax.f32 %v861_v14, 0.0  ;;  %v868_v17 = vadd.f32 %v866_v12, %v864_v13 }
 0x302   : > { %872 = vadd.xlane.f32.xlu0 %v868_v17  ;;  %v869_v18 = vadd.f32 %v867_v15, %v865_v16 }
 0x304   : > { %874 = vadd.xlane.f32.xlu1 %v869_v18 }
 0x38f   : > { %v873_v26 = vpop.xlane.xlu0 %872 }
 0x390   : > { %v877_v27 = vmul.f32 0.0078125, %v873_v26 }
 0x391   : > { %v875_v28 = vpop.xlane.xlu1 %874 }
 0x392   : > { %v2862_v29 = vsub.f32 %v868_v17, %v877_v27  ;;  %v878_v30 = vmul.f32 0.0078125, %v875_v28 }
 0x394   : > { %v2864_v31 = vsub.f32 %v869_v18, %v878_v30  ;;  %v881_v32 = vmul.f32 %v2862_v29, %v2862_v29 }
 0x396   : > { %883 = vadd.xlane.f32.xlu0 %v881_v32  ;;  %v882_v33 = vmul.f32 %v2864_v31, %v2864_v31  ;;  %v1215_v32 = vld [vmem:[#allocation13] sm:$0xff] }
 0x398   : > { %885 = vadd.xlane.f32.xlu1 %v882_v33 }
 0x423   : > { %v884_v53 = vpop.xlane.xlu0 %883 }
 0x424   : > { %v887_v54 = vmul.f32 0.0078125, %v884_v53 }
 0x425   : > { %v886_v55 = vpop.xlane.xlu1 %885 }
 0x426   : > { %v889_v56 = vadd.f32 1e-12, %v887_v54  ;;  %v888_v57 = vmul.f32 0.0078125, %v886_v55 }
 0x428   : > { %2145 = vrsqrt.f32 %v889_v56  ;;  %v890_v58 = vadd.f32 1e-12, %v888_v57 }
 0x42a   : > { %2147 = vrsqrt.f32 %v890_v58 }
 0x432   : > { %v2146_v59 = vpop.eup %2145 }
 0x433   : > { %v893_v61 = vmul.f32 %v2146_v59, %v2862_v29 }
 0x434   : > { %v2148_v62 = vpop.eup %2147 }
 0x435   : > { %v894_v63 = vmul.f32 %v2148_v62, %v2864_v31  ;;  %v901_v0 = vmul.f32 %v1810_v60, %v893_v61 }
 0x437   : > { %v902_v2 = vmul.f32 %v1810_v60, %v894_v63  ;;  %v2887_v3 = vadd.f32 %v1811_v1, %v901_v0 }
 0x439   : > { %v2889_v4 = vadd.f32 %v1811_v1, %v902_v2 }
 0x43b   : > { %v911_v5 = vpack.c.bf16 %v2889_v4, %v2887_v3 }
 0x43d   : > { %1105 = vmatmul.mubr.bf16.vlgmr.msra.gmra.mrb[0].mxu1 %v911_v5  ;;  %1919 = vmatmul.mubr.bf16.vlgmr.msra.gmra.mrb[4].mxu0 %v911_v5 }
 0x43e   : > { %1924 = vmatprep.mubr.msk.bf16.mxu0 %vm2496_vm0, %v2494_v21  ;;  %1930 = vmatprep.mubr.msk.bf16.mxu1 %vm2496_vm0, %v2494_v21 }
 0x510   : > { %v1106_v6 = vpop.f32.mrb[0].mxu1  ;;  %v1149_v7 = vpop.f32.mrb[4].mxu0 }
 0x511   : > { %v1108_v8 = vpop.f32.mrb[1].mxu1  ;;  %v1920_v9 = vpop.f32.mrb[5].mxu0  ;;  %v1156_v12 = vmul.f32 0.088388346, %v1106_v6 }
 0x512   : > { %v1110_v10 = vpop.f32.mrb[2].mxu1  ;;  %v1152_v11 = vpop.f32.mrb[6].mxu0 }
 0x513   : > { %v1157_v13 = vmul.f32 0.088388346, %v1110_v10  ;;  %v2897_v14 = vpack.c.bf16 %v1152_v11, %v1149_v7  ;;  %v1112_v15 = vpop.f32.mrb[3].mxu1  ;;  %v1921_v16 = vpop.f32.mrb[7].mxu0 }
 0x514   : > { %v1159_v17 = vpack.c.bf16 %v1112_v15, %v1108_v8 }
 0x515   : > { %v1158_v18 = vpack.c.bf16 %v1157_v13, %v1156_v12  ;;  %1929 = vmatpush3.bf16.msra.mxu1 %v2897_v14 }
 0x516   : > { %1923 = vmatpush3.bf16.xpose.msra.mxu0 %v1159_v17  ;;  %1934 = vmatprep.subr.bf16.mxu1 %v2494_v21 }
 0x51d   : > { %1925 = vmatmul.mubr.bf16.vlgmr.msra.gmra.mrb[8].mxu0 %v1158_v18 }
 0x5f0   : > { %v1195_v19 = vpop.f32.mrb[8].mxu0 }
 0x5f1   : > { %v1926_v20 = vpop.f32.mrb[9].mxu0  ;;  %v1203_v22 = vsel %vm1202_vm1, %v1195_v19, -inf }
 0x5f2   : > { %1204 = vmax.xlane.f32.xlu0 %v1203_v22  ;;  %v1198_v23 = vpop.f32.mrb[10].mxu0 }
 0x5f3   : > { %v1927_v24 = vpop.f32.mrb[11].mxu0  ;;  %v1206_v25 = vsel %vm1202_vm1, %v1198_v23, -inf }
 0x5f4   : > { %1207 = vmax.xlane.f32.xlu1 %v1206_v25 }
 0x67f   : > { %v1205_v26 = vpop.xlane.xlu0 %1204 }
 0x680   : > { %v1209_v27 = vsub.f32 %v1195_v19, %v1205_v26 }
 0x681   : > { %v1208_v28 = vpop.xlane.xlu1 %1207 }
 0x682   : > { %v1211_v29 = vmul.f32 1.442695, %v1209_v27  ;;  %v1210_v30 = vsub.f32 %v1198_v23, %v1208_v28 }
 0x684   : > { %2149 = vpow2.f32 %v1211_v29  ;;  %v1213_v31 = vmul.f32 1.442695, %v1210_v30 }
 0x686   : > { %2151 = vpow2.f32 %v1213_v31 }
 0x68e   : > { %v2150_v33 = vpop.eup %2149 }
 0x68f   : > { %v1217_v36 = vmul.f32 %v2150_v33, %v1215_v32  ;;  %v1245_v41 = vmul.f32 %v2150_v33, %v1243_v35  ;;  %v1272_v47 = vmul.f32 %v2150_v33, %v1270_v42 }
 0x690   : > { %v2152_v37 = vpop.eup %2151 }
 0x691   : > { %v1219_v39 = vsel %vm1202_vm1, %v1217_v36, 0.0  ;;  %v1218_v40 = vmul.f32 %v2152_v37, %v1216_v34  ;;  %v1246_v44 = vmul.f32 %v2152_v37, %v1244_v38  ;;  %v1247_v46 = vsel %vm1202_vm1, %v1245_v41, 0.0 }
 0x692   : > { %1220 = vadd.xlane.f32.xlu0 %v1219_v39  ;;  %v1273_v49 = vmul.f32 %v2152_v37, %v1271_v45  ;;  %v1274_v50 = vsel %vm1202_vm1, %v1272_v47, 0.0 }
 0x693   : > { %v1222_v43 = vsel %vm1202_vm1, %v1218_v40, 0.0  ;;  %v1250_v48 = vsel %vm1202_vm1, %v1246_v44, 0.0 }
 0x694   : > { %1223 = vadd.xlane.f32.xlu1 %v1222_v43  ;;  %v1277_v51 = vsel %vm1202_vm1, %v1273_v49, 0.0 }
 0x696   : > { %1248 = vadd.xlane.f32.xlu0 %v1247_v46 }
 0x698   : > { %1251 = vadd.xlane.f32.xlu1 %v1250_v48 }
 0x69a   : > { %1275 = vadd.xlane.f32.xlu0 %v1274_v50 }
 0x69c   : > { %1278 = vadd.xlane.f32.xlu1 %v1277_v51  ;;  %v2134_v51 = vld [vmem:[#allocation11 + $0x8] sm:$0xff]  }
 0x71f   : > { %v1221_v52 = vpop.xlane.xlu0 %1220 }
 0x720   : > { %2153 = vrcp.f32 %v1221_v52  ;;  %v2136_v52 = vld [vmem:[#allocation11 + $0x18] sm:$0xff]  }
 0x721   : > { %v1224_v53 = vpop.xlane.xlu1 %1223 }
 0x722   : > { %2155 = vrcp.f32 %v1224_v53  ;;  %v2137_v53 = vld [vmem:[#allocation11 + $0x20] sm:$0xff]  }
 0x723   : > { %v1249_v54 = vpop.xlane.xlu0 %1248 }
 0x724   : > { %2157 = vrcp.f32 %v1249_v54  ;;  %v2138_v54 = vld [vmem:[#allocation11 + $0x28] sm:$0xff]  }
 0x725   : > { %v1252_v55 = vpop.xlane.xlu1 %1251 }
 0x726   : > { %2159 = vrcp.f32 %v1252_v55  ;;  %v2139_v55 = vld [vmem:[#allocation11 + $0x30] sm:$0xff]  }
 0x727   : > { %v1276_v56 = vpop.xlane.xlu0 %1275 }
 0x728   : > { %2161 = vrcp.f32 %v1276_v56  ;;  %v2140_v56 = vld [vmem:[#allocation11 + $0x38] sm:$0xff]  }
 0x729   : > { %v1279_v57 = vpop.xlane.xlu1 %1278 }
 0x72a   : > { %v2154_v58 = vpop.eup %2153  ;;  %2163 = vrcp.f32 %v1279_v57 }
 0x72b   : > { %v1227_v59 = vmul.f32 %v2154_v58, %v1217_v36 }
 0x72c   : > { %v2156_v60 = vpop.eup %2155 }
 0x72d   : > { %v1228_v61 = vmul.f32 %v2156_v60, %v1218_v40  ;;  %v1231_v63 = vsel %vm1202_vm1, %v1227_v59, 0.0 }
 0x72e   : > { %v2158_v62 = vpop.eup %2157 }
 0x72f   : > { %v1232_v0 = vsel %vm1202_vm1, %v1228_v61, 0.0  ;;  %v1255_v1 = vmul.f32 %v2158_v62, %v1245_v41 }
 0x730   : > { %v2160_v2 = vpop.eup %2159  ;;  %v1233_v5 = vadd.f32 %v1232_v0, %v1231_v63 }
 0x731   : > { %v1256_v6 = vmul.f32 %v2160_v2, %v1246_v44  ;;  %v1259_v9 = vsel %vm1202_vm1, %v1255_v1, 0.0  ;;  %v1257_v43 = vadd.f32 %v1255_v1, %v1227_v59 }
 0x732   : > { %v2162_v7 = vpop.eup %2161  ;;  %v1234_v8 = vrot.slane %v1233_v5, 4 }
 0x733   : > { %v1260_v10 = vsel %vm1202_vm1, %v1256_v6, 0.0  ;;  %v1282_v11 = vmul.f32 %v2162_v7, %v1272_v47  ;;  %v1258_v40 = vadd.f32 %v1256_v6, %v1228_v61 }
 0x734   : > { %v2164_v12 = vpop.eup %2163  ;;  %v1235_v13 = vadd.f32 %v1234_v8, %v1233_v5  ;;  %v1261_v15 = vadd.f32 %v1260_v10, %v1259_v9 }
 0x735   : > { %v1283_v16 = vmul.f32 %v2164_v12, %v1273_v49  ;;  %v1286_v19 = vsel %vm1202_vm1, %v1282_v11, 0.0  ;;  %v1284_v46 = vadd.f32 %v1282_v11, %v1257_v43  ;;  %v2133_v49 = vld [vmem:[#allocation11] sm:$0xff]  }
 0x736   : > { %v1236_v17 = vrot.slane %v1235_v13, 2  ;;  %v1262_v18 = vrot.slane %v1261_v15, 4 }
 0x737   : > { %v1287_v20 = vsel %vm1202_vm1, %v1283_v16, 0.0  ;;  %v1285_v44 = vadd.f32 %v1283_v16, %v1258_v40  ;;  %v1345_v48 = vmul.f32 0.33333334, %v1284_v46 }
 0x738   : > { %v1263_v22 = vadd.f32 %v1262_v18, %v1261_v15  ;;  %v1288_v23 = vadd.f32 %v1287_v20, %v1286_v19  ;;  %v1237_v24 = vadd.f32 %v1236_v17, %v1235_v13 }
 0x739   : > { %v1346_v47 = vmul.f32 0.33333334, %v1285_v44 }
 0x73a   : > { %v1264_v25 = vrot.slane %v1263_v22, 2  ;;  %v1289_v26 = vrot.slane %v1288_v23, 4  ;;  %v1238_v29 = vrot.slane %v1237_v24, 1 }
 0x73b   : > { %v1347_v50 = vpack.c.bf16 %v1346_v47, %v1345_v48 }
 0x73c   : > { %v1265_v27 = vadd.f32 %v1264_v25, %v1263_v22  ;;  %v1290_v28 = vadd.f32 %v1289_v26, %v1288_v23  ;;  %v1239_v34 = vadd.f32 %v1238_v29, %v1237_v24  ;;  %v1846_v24 = vld [vmem:[%s3076_s26] ss:$0 sm:$0xff]  ;;  %s2371_s26 = sshll.u32 %s2497_s11, 4  ;;  %s2372_s26 = int_to_ptr.vmem [resolvable:$false] %s2371_s26 }
 0x73d   : > { %s2373_s30 = scalar_lea.vmem %s2372_s26, 512  ;;  %p2374_p1 = scmp.lt.s32.totalorder %s2950_s6, %s2372_s26 }
 0x73e   : > { %v1266_v30 = vrot.slane %v1265_v27, 1  ;;  %v1291_v31 = vrot.slane %v1290_v28, 2  ;;  %v1241_v38 = vmul.f32 0.0625, %v1239_v34  ;;  %p2375_p3 = scmp.lt.s32.totalorder %s2373_s30, %s2367_s29 }
 0x740   : > { %v1292_v32 = vadd.f32 %v1291_v31, %v1290_v28  ;;  %v1267_v33 = vadd.f32 %v1266_v30, %v1265_v27  ;;  %v1847_v27 = vld [vmem:[%s3077_s15] ss:$0 sm:$0xff]  ;;  %p2376_p8 = por %p2375_p3, %p2374_p1 }
 0x742   : > { %v1293_v35 = vrot.slane %v1292_v32, 1  ;;  %v1268_v36 = vmul.f32 0.0625, %v1267_v33  ;;  %p2377_p13 = pnand %p2376_p8, %p2370_p4 }
 0x744   : > { %v1294_v37 = vadd.f32 %v1293_v35, %v1292_v32  ;;  %v1297_v41 = vsel %vm1296_vm2, %v1241_v38, %v1268_v36 }
 0x746   : > { %v1295_v39 = vmul.f32 0.0625, %v1294_v37 }
 0x748   : > { %v1299_v42 = vsel %vm1298_vm3, %v1297_v41, %v1295_v39 }
 0x749   : > { %v1300_v45 = vpack.c.bf16 %v1299_v42, %v1299_v42 }
 0x74b   : > { %1931 = vmatmul.mubr.msk.bf16.vlgmr.msra.gmra.mrb[4].mxu1 %vm1202_vm1, %v1300_v45 }
 0x74c   : > { %1935 = vmatpush3.bf16.msra.mxu1 %v2897_v14  ;;  %1936 = vmatprep.mubr.msk.bf16.mxu1 %vm2496_vm0, %v2494_v21  ;;  %v2135_v14 = vld [vmem:[#allocation11 + $0x10] sm:$0xff]  }
 0x74d   : > { %1940 = vmatprep.subr.bf16.mxu1 %v2494_v21 }
 0x753   : > { %1937 = vmatmul.mubr.msk.bf16.vlgmr.msra.gmra.mrb[8].mxu1 %vm1202_vm1, %v1347_v50 }
 0x754   : > { %1941 = vmatpush3.bf16.msra.mxu1 %v2133_v49  ;;  %1956 = vmatprep.mubr.msk.bf16.mxu1 %vm2496_vm0, %v2494_v21 }
 0x755   : > { %1942 = vmatprep.subr.bf16.mxu1 %v2494_v21 }
 0x758   : > { %1943 = vmatpush3.bf16.msra.mxu1 %v2134_v51 }
 0x759   : > { %1944 = vmatprep.subr.bf16.mxu1 %v2494_v21 }
 0x75c   : > { %1945 = vmatpush3.bf16.msra.mxu1 %v2135_v14 }
 0x75d   : > { %1946 = vmatprep.subr.bf16.mxu1 %v2494_v21 }
 0x760   : > { %1947 = vmatpush3.bf16.msra.mxu1 %v2136_v52 }
 0x761   : > { %1948 = vmatprep.subr.bf16.mxu1 %v2494_v21 }
 0x764   : > { %1949 = vmatpush3.bf16.msra.mxu1 %v2137_v53 }
 0x765   : > { %1950 = vmatprep.subr.bf16.mxu1 %v2494_v21 }
 0x768   : > { %1951 = vmatpush3.bf16.msra.mxu1 %v2138_v54 }
 0x769   : > { %1952 = vmatprep.subr.bf16.mxu1 %v2494_v21 }
 0x76c   : > { %1953 = vmatpush3.bf16.msra.mxu1 %v2139_v55 }
 0x76d   : > { %1954 = vmatprep.subr.bf16.mxu1 %v2494_v21 }
 0x770   : > { %1955 = vmatpush3.bf16.msra.mxu1 %v2140_v56 }
 0x81e   : > { %v1338_v57 = vpop.f32.mrb[4].mxu1 }
 0x81f   : > { %1344 = vst [vmem:[%s615_s23] sm:$0x7] %v1338_v57  ;;  %v1932_v58 = vpop.f32.mrb[5].mxu1  ;;  %s2948_s23 = scalar_lea.hbm %s3078_s16, %s1855_s12 }
 0x820   : > { %v1341_v59 = vpop.f32.mrb[6].mxu1 }
 0x821   : > { %v1933_v60 = vpop.f32.mrb[7].mxu1 }
 0x826   : > { %v1385_v61 = vpop.f32.mrb[8].mxu1 }
 0x827   : > { %v1938_v62 = vpop.f32.mrb[9].mxu1 }
 0x828   : > { %v1388_v63 = vpop.f32.mrb[10].mxu1 }
 0x829   : > { %v1392_v0 = vpack.c.bf16 %v1388_v63, %v1385_v61  ;;  %v1939_v1 = vpop.f32.mrb[11].mxu1 }
 0x82b   : > { %1957 = vmatmul.mubr.bf16.vlgmr.msra.gmra.mrb[12].mxu1 %v1392_v0 }
 0x8fe   : > { %v1491_v21 = vpop.f32.mrb[12].mxu1 }
 0x8ff   : > { %v1498_v2 = vadd.f32 %v1491_v21, %v2887_v3  ;;  %v1958_v5 = vpop.f32.mrb[13].mxu1 }
 0x900   : > { %v1494_v6 = vpop.f32.mrb[14].mxu1 }
 0x901   : > { %v1499_v7 = vadd.f32 %v1494_v6, %v2889_v4  ;;  %1502 = vadd.xlane.f32.xlu0 %v1498_v2  ;;  %v1959_v8 = vpop.f32.mrb[15].mxu1 }
 0x903   : > { %1504 = vadd.xlane.f32.xlu1 %v1499_v7 }
 0x98e   : > { %v1503_v9 = vpop.xlane.xlu0 %1502 }
 0x98f   : > { %v1506_v10 = vmul.f32 0.0078125, %v1503_v9 }
 0x990   : > { %v1505_v11 = vpop.xlane.xlu1 %1504 }
 0x991   : > { %v1508_v12 = vsub.f32 %v1498_v2, %v1506_v10  ;;  %v1507_v13 = vmul.f32 0.0078125, %v1505_v11 }
 0x993   : > { %v1509_v15 = vsub.f32 %v1499_v7, %v1507_v13  ;;  %v1510_v16 = vmul.f32 %v1508_v12, %v1508_v12 }
 0x995   : > { %1512 = vadd.xlane.f32.xlu0 %v1510_v16  ;;  %v1511_v17 = vmul.f32 %v1509_v15, %v1509_v15 }
 0x997   : > { %1514 = vadd.xlane.f32.xlu1 %v1511_v17 }
 0xa22   : > { %v1513_v18 = vpop.xlane.xlu0 %1512 }
 0xa23   : > { %v1516_v3 = vmul.f32 0.0078125, %v1513_v18 }
 0xa24   : > { %v1515_v19 = vpop.xlane.xlu1 %1514 }
 0xa25   : > { %v1518_v20 = vadd.f32 1e-12, %v1516_v3  ;;  %v1517_v4 = vmul.f32 0.0078125, %v1515_v19 }
 0xa27   : > { %2165 = vrsqrt.f32 %v1518_v20  ;;  %v1519_v22 = vadd.f32 1e-12, %v1517_v4 }
 0xa29   : > { %2167 = vrsqrt.f32 %v1519_v22 }
 0xa31   : > { %v2166_v23 = vpop.eup %2165 }
 0xa32   : > { %v1522_v25 = vmul.f32 %v2166_v23, %v1508_v12 }
 0xa33   : > { %v2168_v26 = vpop.eup %2167 }
 0xa34   : > { %v1530_v28 = vmul.f32 %v1846_v24, %v1522_v25  ;;  %v1523_v29 = vmul.f32 %v2168_v26, %v1509_v15 }
 0xa36   : > { %v1538_v30 = vadd.f32 %v1847_v27, %v1530_v28  ;;  %v1531_v31 = vmul.f32 %v1846_v24, %v1523_v29 }
 0xa38   : > { %v1539_v32 = vadd.f32 %v1847_v27, %v1531_v31  ;;  %1540 = vst [vmem:[%s599_s22] sm:$0xff] %v1538_v30 }
 0xa3a   : > { %1541 = vst [vmem:[%s599_s22 + $0x8] sm:$0xff] %v1539_v32  ;;  %v1542_v33 = vadd.f32 %v1539_v32, %v1538_v30 }
 0xa3b   : > { %2380 = shalt.err (!%p2377_p13)
}
 0xa3c   : > { %s2381_s27 = scalar_lea.hbm %s2948_s23, 256  ;;  %s2385_s22 = scalar_lea.hbm %s3078_s16, 512 }
 0xa3d   : > { %p2382_p0 = scmp.ne.s32.totalorder %s2948_s23, %s2381_s27  ;;  %p2386_p10 = scmp.lt.u32.totalorder %s2948_s23, %s3078_s16 }
 0xa3e   : > { %p2387_p11 = scmp.lt.u32.totalorder %s2385_s22, %s2381_s27  ;;  %p2389_p12 = scmp.lt.u32.totalorder %s2381_s27, %s2948_s23 }
 0xa3f   : > { %p2383_p2 = pnand %p2382_p0, %p3079_p5 }
 0xa40   : > { %p2388_p6 = por %p2387_p11, %p2386_p10 }
 0xa41   : > { %p2384_p9 = pneg %p2383_p2 }
 0xa42   : > { %p2390_p7 = por %p2389_p12, %p2388_p6 }
 0xa44   : > { %p2391_p4 = pnand %p2390_p7, %p2384_p9 }
 0xa46   : > { %2394 = shalt.err (!%p2391_p4)
}
 0xa47   : > { %s2498_s29 = smov 128   ;;  %s2499_s11 = smov 8   ;;  %v1543_v34 = vrot.slane %v1542_v33, 4 }
 0xa48   : > { %1986 = dma.vmem_to_hbm [thread:$0]  (%p3079_p5), %s2950_s6, 256, %s2948_s23, %s1552_s14, %s2498_s29, %s2498_s29, %s2499_s11  }
 0xa49   : > { %v1544_v35 = vadd.f32 %v1543_v34, %v1542_v33  ;;  %s1851_s26 = sshll.u32 %s2602_s24, 4  ;;  %s611_s30 = scalar_lea.vmem [#allocation15], %s2830_s28 }
 0xa4a   : > { %s1592_s27 = sshll.u32 %s611_s30, 4  ;;  %s3080_s22 = sld [smem:[#allocation31_spill]]  ;;  %s2983_s27 = int_to_ptr.vmem [resolvable:$true] %s1592_s27 }
 0xa4b   : > { %v1545_v36 = vrot.slane %v1544_v35, 2  ;;  %s1561_s6 = scalar_lea.sflag [#allocation16], %s2830_s28  ;;  %s2395_s23 = scalar_lea.vmem %s2983_s27, 16 }
 0xa4c   : > { %p2396_p1 = scmp.ne.s32.totalorder %s2983_s27, %s2395_s23  ;;  %s2500_s24 = smov [#allocation15]  }
 0xa4d   : > { %v1546_v37 = vadd.f32 %v1545_v36, %v1544_v35  ;;  %s2399_s14 = sshll.u32 %s2500_s24, 4  ;;  %s2400_s14 = int_to_ptr.vmem [resolvable:$false] %s2399_s14 }
 0xa4e   : > { %p2397_p3 = pnand %p2396_p1, %p3079_p5  ;;  %s2401_s2 = scalar_lea.vmem %s2400_s14, 32 }
 0xa4f   : > { %v1547_v38 = vrot.slane %v1546_v37, 1  ;;  %p2402_p13 = scmp.lt.s32.totalorder %s2983_s27, %s2400_s14  ;;  %p2403_p0 = scmp.lt.s32.totalorder %s2401_s2, %s2395_s23 }
 0xa50   : > { %s2981_s25 = scalar_lea.hbm %s3080_s22, %s1851_s26  ;;  %p2398_p8 = pneg %p2397_p3 }
 0xa51   : > { %v1548_v39 = vadd.f32 %v1547_v38, %v1546_v37  ;;  %p2404_p2 = por %p2403_p0, %p2402_p13 }
 0xa53   : > { %v1549_v40 = vmul.f32 0.0625, %v1548_v39  ;;  %p2405_p9 = pnand %p2404_p2, %p2398_p8 }
 0xa55   : > { %1550 = vst [vmem:[%s611_s30] sm:$0x1] %v1549_v40 }
 0xa56   : > { %2408 = shalt.err (!%p2405_p9)
}
 0xa57   : > { %s2409_s28 = scalar_lea.hbm %s2981_s25, 16  ;;  %s2413_s26 = scalar_lea.hbm %s3080_s22, 32 }
 0xa58   : > { %p2410_p10 = scmp.ne.s32.totalorder %s2981_s25, %s2409_s28  ;;  %p2414_p12 = scmp.lt.u32.totalorder %s2981_s25, %s3080_s22 }
 0xa59   : > { %p2415_p7 = scmp.lt.u32.totalorder %s2413_s26, %s2409_s28  ;;  %p2417_p1 = scmp.lt.u32.totalorder %s2409_s28, %s2981_s25 }
 0xa5a   : > { %p2411_p11 = pnand %p2410_p10, %p3079_p5 }
 0xa5b   : > { %p2416_p4 = por %p2415_p7, %p2414_p12 }
 0xa5c   : > { %p2412_p6 = pneg %p2411_p11 }
 0xa5d   : > { %p2418_p3 = por %p2417_p1, %p2416_p4 }
 0xa5f   : > { %p2419_p8 = pnand %p2418_p3, %p2412_p6 }
 0xa61   : > { %2422 = shalt.err (!%p2419_p8)
}
 0xa62   : > { %1987 = dma.vmem_to_hbm [thread:$0]  (%p3079_p5), %s2983_s27, 16, %s2981_s25, %s1561_s6  }
 0xa63 PF: > { %s1604_s12 = sand.u32 1, %s2465_s18   ;;  %p3081_p13 = scmp.ne.s32.totalorder %s3064_s13, 0 }
 0xa64   : > { %p3082_p0 = scmp.ge.s32.totalorder %s2477_s21, 2  ;;  %s1605_s23 = scalar_lea.sflag [#allocation4], %s1604_s12 }
 0xa66   : > { %p2014_p2 = pnand %p3082_p0, %p3081_p13 }
 0xa68   : > { %2456 = dma.done.wait (!%p2014_p2), %s1605_s23, 256  }
 0xa69   : > { %2458 = vsyncadd (!%p2014_p2), %s1605_s23, 4294967040  ;;  %s1621_s24 = scalar_lea.sflag [#allocation16], %s1604_s12 }
 0xa6a   : > { %2460 = dma.done.wait (!%p2014_p2), %s1621_s24, 16  }
 0xa6b   : > { %2462 = vsyncadd (!%p2014_p2), %s1621_s24, 4294967280  ;;  %p35_p5 = scmp.ge.s32.totalorder %s2751_s17, 4   ;;  %s3083_s18 = smov %s2469_s19 }
 0xa6c   : > { %s3084_s19 = smov %s2473_s20  ;;  %s3085_s20 = smov %s2762_s4 }
 0xa6d   : > { %s3086_s21 = smov %s2751_s17  ;;  %37 = sbr.rel (!%p35_p5) target bundleno = 20 (0x14), region = 172 }
 0xa74   :  { %1625 = vsyncpa [#allocation3], 1 }
 0xa75   :  { %1627 = vsyncpa [#allocation3 + $0x1], 1 }
 0xa76   :  { %1628 = vsyncpa [#allocation6], 1 }
 0xa77   :  { %1629 = vsyncpa [#allocation9], 1 }
 0xa78   :  { %1630 = vsyncpa [#allocation12], 1 }
 0xa79   :  { %1631 = vsyncpa [#allocation4], 1 }
 0xa7a   :  { %1633 = vsyncpa [#allocation4 + $0x1], 1 }
 0xa7b   :  { %1634 = vsyncpa [#allocation16], 1 }
 0xa7c   :  { %1636 = vsyncpa [#allocation16 + $0x1], 1 }

</bundles_post_ra>
